<compile_context>
chip_gen: v7x
topology: tpu7x:2x2x1
jax: 0.10.0
libtpu: 0.0.40
codegen_flags: <defaults>
</compile_context>

<pallas_src>
import numpy as np
import jax
import jax.numpy as jnp
from jax.experimental import pallas as pl
from jax.experimental.pallas import tpu as pltpu

_MIN_TILE = 16  # bf16 sublane tile; keeps all blocks layout-friendly


def _round_up(x, m):
    return ((x + m - 1) // m) * m


def _cdiv(a, b):
    return -(-a // b)


# ----------------------------- kernels --------------------------------------


def _edge_conv_center_kernel(xj_ref, xc_ref, w1_ref, w2_ref, b_ref, o_ref):
    """Fast path (graph[1] == center index):  out = ReLU(xc@W1 + max_k(xj_k@W2) + b).

    xj_ref: (K, TN, C)  gathered neighbor features (bf16/f32)
    xc_ref: (TN, C)     un-expanded center features
    w1_ref: (C, Coutp)  (W[:, :C] - W[:, C:]).T   (edge-conv algebra)
    w2_ref: (C, Coutp)  W[:, C:].T
    b_ref:  (1, Coutp)  f32 bias (zero padded)
    o_ref:  (TN, Coutp) lane-dense output
    """
    K = xj_ref.shape[0]
    w2 = w2_ref[...]
    # K is small & static: unrolled chain of 2-D MXU matmuls with a VPU max
    # accumulator.  Bias, ReLU and the k-independent center term stay outside
    # the loop (exact: ReLU monotone, xc@W1 + b independent of k).
    acc = jnp.dot(xj_ref[0], w2, preferred_element_type=jnp.float32)
    for k in range(1, K):
        acc = jnp.maximum(acc, jnp.dot(xj_ref[k], w2, preferred_element_type=jnp.float32))
    yc = jnp.dot(xc_ref[...], w1_ref[...], preferred_element_type=jnp.float32)
    o_ref[...] = jnp.maximum(acc + yc + b_ref[...], 0.0).astype(o_ref.dtype)


def _edge_conv_general_kernel(xi_ref, xj_ref, w1_ref, w2_ref, b_ref, o_ref):
    """General path (arbitrary graph[1]):  out = ReLU(max_k(xi_k@W1 + xj_k@W2) + b)."""
    K = xi_ref.shape[0]
    w1 = w1_ref[...]
    w2 = w2_ref[...]
    acc = None
    for k in range(K):
        yk = jnp.dot(xi_ref[k], w1, preferred_element_type=jnp.float32)
        yk = yk + jnp.dot(xj_ref[k], w2, preferred_element_type=jnp.float32)
        acc = yk if acc is None else jnp.maximum(acc, yk)
    o_ref[...] = jnp.maximum(acc + b_ref[...], 0.0).astype(o_ref.dtype)


# ----------------------------- tiling helpers -------------------------------


def _vmem_capacity_bytes():
    try:
        cap = int(pltpu.get_tpu_info().vmem_capacity_bytes)
        if cap > 0:
            return cap
    except Exception:
        pass
    return 64 * 1024 * 1024  # conservative default (v7x per-TensorCore VMEM)


def _tile_footprint(t, K, C, coutp, feat_isz, out_isz, fast_path):
    """Double-buffered VMEM bytes for one grid step at row tile t."""
    c_lanes = _round_up(max(C, 1), 128)            # minor dim padded to the 128-lane tile
    n_feat = (K + 1) if fast_path else (2 * K)     # x_j (+ x_center)  or  x_i + x_j
    f = 2 * n_feat * t * c_lanes * feat_isz        # feature tiles, double-buffered
    f += 2 * t * coutp * out_isz                   # output tile, double-buffered
    f += 2 * 2 * c_lanes * coutp * feat_isz        # the two weight halves
    f += 2 * 2 * coutp * 4                         # bias row
    return f


def _choose_tile_n(M, K, C, coutp, feat_isz, out_isz, budget_bytes, fast_path):
    """Biggest row tile that fits the VMEM budget, but with >= 4 (even) grid
    steps whenever M permits (DMA/compute overlap + v7x dual-TC sharding),
    and padding-aware (tile derived from the step count, not vice versa)."""
    t_vmem = _MIN_TILE
    for t in (2048, 1024, 512, 256, 128, 64, 32, 16):
        if _tile_footprint(t, K, C, coutp, feat_isz, out_isz, fast_path) <= budget_bytes:
            t_vmem = t
            break
    max_steps = _cdiv(M, _MIN_TILE)
    steps = max(_cdiv(M, t_vmem), min(4, max_steps))
    if steps % 2 and steps < max_steps:
        steps += 1                                 # even grid -> both v7x TensorCores busy
    tile_n = min(_round_up(_cdiv(M, steps), _MIN_TILE), t_vmem)
    return max(tile_n, _MIN_TILE)


# ----------------------------- wrapper ---------------------------------------


def dygraph_conv2d(x, graph, weight, bias, *, tile_n=None, use_bf16=True,
                   center_identity=None):
    """DyGraphConv2d forward (conv='edge', act='relu', norm=None, bias=True).

    x:      [B, C, H, W] float32 (NCHW, matching the PyTorch module)
    graph:  [2, B, N, K] int32, N = H*W  (graph[0]=neighbor idx, graph[1]=center idx)
    weight: [Cout, 2C, 1, 1] float32 (torch Conv2d layout)
    bias:   [Cout] float32
    returns [B, Cout, H, W]
    """
    B, C, H, W = x.shape
    N = H * W
    K = graph.shape[-1]
    Cout = weight.shape[0]
    M = B * N

    cdt = jnp.bfloat16 if use_bf16 else jnp.float32
    feat_isz = 2 if use_bf16 else 4
    out_isz = feat_isz
    coutp = _round_up(Cout, 128)  # lane-dense output -> unmasked vst path

    # graph[1] is the center index in DyGraphConv2d; verify when concrete,
    # otherwise take the exact general path.
    if center_identity is None:
        try:
            g1 = np.asarray(graph[1])
            center_identity = bool(
                (g1 == np.arange(N, dtype=g1.dtype)[None, :, None]).all())
        except Exception:
            center_identity = False
    fast = bool(center_identity)

    cap = _vmem_capacity_bytes()
    budget = max(24 * 1024 * 1024, int(0.45 * cap))  # v5e/v6e (128 MiB) vs v7x (64 MiB)

    if tile_n is None:
        tile_n = _choose_tile_n(M, K, C, coutp, feat_isz, out_isz, budget, fast)
    tile_n = max(_round_up(int(tile_n), _MIN_TILE), _MIN_TILE)
    m_pad = _round_up(M, tile_n)
    grid = (m_pad // tile_n,)

    footprint = _tile_footprint(tile_n, K, C, coutp, feat_isz, out_isz, fast)
    vmem_limit = int(min(max(footprint + 16 * 1024 * 1024, 32 * 1024 * 1024),
                         0.8 * cap))

    # ---- plain-JAX glue ------------------------------------------------------
    # x -> [M, C] row-major in the MXU dtype (the only full-tensor layout change).
    x_rows = jnp.transpose(x.reshape(B, C, N), (0, 2, 1)).reshape(M, C).astype(cdt)

    # Gather neighbor features directly in kernel layout [K, M, C] via global row ids.
    # TODO(synk): move this gather in-kernel (x resident in VMEM + scalar-prefetched
    # indices) to drop the K-expanded HBM round-trip entirely.
    def gather(idx):                                    # idx: [B, N, K]
        idx_k = jnp.transpose(idx, (2, 0, 1))           # [K, B, N]  (tiny int transpose)
        base = (jnp.arange(B, dtype=idx_k.dtype) * N)[None, :, None]
        rows = (idx_k + base).reshape(K, M)             # global row ids into x_rows
        return jnp.take(x_rows, rows, axis=0)           # [K, M, C]

    x_j = gather(graph[0])
    if m_pad != M:                                      # ragged B*H*W: pad rows (sliced off later)
        x_j = jnp.pad(x_j, ((0, 0), (0, m_pad - M), (0, 0)))

    # cat([x_i, x_j - x_i]) @ W  ==  x_i @ (W1 - W2) + x_j @ W2   (split in f32, cast once)
    w = weight[:, :, 0, 0].astype(jnp.float32)          # [Cout, 2C]
    w1 = (w[:, :C] - w[:, C:]).T                        # [C, Cout]
    w2 = w[:, C:].T                                     # [C, Cout]
    w1 = jnp.pad(w1, ((0, 0), (0, coutp - Cout))).astype(cdt)
    w2 = jnp.pad(w2, ((0, 0), (0, coutp - Cout))).astype(cdt)
    b_row = jnp.pad(bias.astype(jnp.float32), (0, coutp - Cout)).reshape(1, coutp)

    xj_spec = pl.BlockSpec((K, tile_n, C), lambda i: (0, i, 0))
    w_spec = pl.BlockSpec((C, coutp), lambda i: (0, 0))
    b_spec = pl.BlockSpec((1, coutp), lambda i: (0, 0))
    out_spec = pl.BlockSpec((tile_n, coutp), lambda i: (i, 0))
    cparams = pltpu.CompilerParams(
        dimension_semantics=("parallel",),
        vmem_limit_bytes=vmem_limit,
    )
    out_shape = jax.ShapeDtypeStruct((m_pad, coutp), cdt)

    if fast:
        x_c = x_rows
        if m_pad != M:
            x_c = jnp.pad(x_c, ((0, m_pad - M), (0, 0)))
        out_pad = pl.pallas_call(
            _edge_conv_center_kernel,
            out_shape=out_shape,
            grid=grid,
            in_specs=[xj_spec,
                      pl.BlockSpec((tile_n, C), lambda i: (i, 0)),
                      w_spec, w_spec, b_spec],
            out_specs=out_spec,
            compiler_params=cparams,
        )(x_j, x_c, w1, w2, b_row)
    else:
        x_i = gather(graph[1])
        if m_pad != M:
            x_i = jnp.pad(x_i, ((0, 0), (0, m_pad - M), (0, 0)))
        out_pad = pl.pallas_call(
            _edge_conv_general_kernel,
            out_shape=out_shape,
            grid=grid,
            in_specs=[xj_spec, xj_spec, w_spec, w_spec, b_spec],
            out_specs=out_spec,
            compiler_params=cparams,
        )(x_i, x_j, w1, w2, b_row)

    out = out_pad[:M, :Cout].astype(jnp.float32)
    # [B*N, Cout] -> [B, Cout, H, W]  (matches torch .reshape(B, -1, H, W))
    out = jnp.transpose(out.reshape(B, N, Cout), (0, 2, 1)).reshape(B, Cout, H, W)
    return out.astype(x.dtype)


if __name__ == "__main__":
    key = jax.random.PRNGKey(0)
    k_x, k_w, k_b, k_g = jax.random.split(key, 4)

    # Small shapes consistent with the module: in_channels=4, out_channels=8,
    # kernel_size (K neighbors) = 9, B=2, H=W=16.
    B, C, H, W = 2, 4, 16, 16
    Cout, K = 8, 9
    N = H * W

    x = jax.random.normal(k_x, (B, C, H, W), dtype=jnp.float32)
    weight = 0.1 * jax.random.normal(k_w, (Cout, 2 * C, 1, 1), dtype=jnp.float32)
    bias = 0.1 * jax.random.normal(k_b, (Cout,), dtype=jnp.float32)

    # graph[0] = neighbor indices, graph[1] = center indices (as dense_knn_matrix does)
    nbr_idx = jax.random.randint(k_g, (B, N, K), 0, N, dtype=jnp.int32)
    ctr_idx = jnp.broadcast_to(jnp.arange(N, dtype=jnp.int32)[None, :, None], (B, N, K))
    graph = jnp.stack([nbr_idx, ctr_idx], axis=0)  # [2, B, N, K]

    out = dygraph_conv2d(x, graph, weight, bias)
    out = jax.block_until_ready(out)
    assert out.shape == (B, Cout, H, W)

    # Pure-JAX f32 reference mirroring the PyTorch module exactly.
    xf = x.reshape(B, C, N)

    def sel(idx):  # [B, N, K] -> [B, C, N, K]
        return jax.vmap(lambda xb, ib: xb[:, ib])(xf, idx)

    x_i_r = sel(graph[1])
    x_j_r = sel(graph[0])
    feat = jnp.concatenate([x_i_r, x_j_r - x_i_r], axis=1)            # [B, 2C, N, K]
    y = jnp.einsum("bcnk,dc->bdnk", feat, weight[:, :, 0, 0]) + bias[None, :, None, None]
    ref = jnp.max(jnp.maximum(y, 0.0), axis=-1).reshape(B, Cout, H, W)

    err = float(jnp.max(jnp.abs(out - ref)))
    # Tolerance accommodates bf16 MXU operands + bf16 output writeback (f32 accumulate).
    assert jnp.allclose(out, ref, atol=3e-2, rtol=3e-2), f"mismatch vs reference (max err {err})"

    # Also exercise the general (arbitrary graph[1]) kernel path once.
    out_gen = jax.block_until_ready(
        dygraph_conv2d(x, graph, weight, bias, center_identity=False))
    assert jnp.allclose(out_gen, ref, atol=3e-2, rtol=3e-2), "general-path mismatch"

    print("KERNEL_OK")
</pallas_src>

<mosaic_0001>
module attributes {stable_mosaic.version = 11 : i64} {
  func.func @_edge_conv_center_kernel(%arg0: i32, %arg1: memref<9x128x4xbf16, #tpu.memory_space<vmem>>, %arg2: memref<128x4xbf16, #tpu.memory_space<vmem>>, %arg3: memref<4x128xbf16, #tpu.memory_space<vmem>>, %arg4: memref<4x128xbf16, #tpu.memory_space<vmem>>, %arg5: memref<1x128xf32, #tpu.memory_space<vmem>>, %arg6: memref<128x128xbf16, #tpu.memory_space<vmem>>) attributes {dimension_semantics = [#tpu.dimension_semantics<parallel>], iteration_bounds = array<i64: 4>, scalar_prefetch = 0 : i64, scratch_operands = 0 : i64, tpu.core_type = #tpu.core_type<tc>, window_params = [{transform_indices = @transform_0, window_bounds = array<i64: 9, 128, 4>}, {transform_indices = @transform_1, window_bounds = array<i64: 128, 4>}, {pipeline_mode = #tpu.pipeline_mode<synchronous>, transform_indices = @transform_2, window_bounds = array<i64: 4, 128>}, {pipeline_mode = #tpu.pipeline_mode<synchronous>, transform_indices = @transform_3, window_bounds = array<i64: 4, 128>}, {pipeline_mode = #tpu.pipeline_mode<synchronous>, transform_indices = @transform_4, window_bounds = array<i64: 1, 128>}, {transform_indices = @transform_5, window_bounds = array<i64: 128, 128>}]} {
    %c0 = arith.constant 0 : index
    %c0_0 = arith.constant 0 : index
    %0 = vector.load %arg4[%c0, %c0_0] : memref<4x128xbf16, #tpu.memory_space<vmem>>, vector<4x128xbf16>
    %c0_1 = arith.constant 0 : index
    %c0_2 = arith.constant 0 : index
    %c0_3 = arith.constant 0 : index
    %1 = vector.load %arg1[%c0_1, %c0_2, %c0_3] : memref<9x128x4xbf16, #tpu.memory_space<vmem>>, vector<1x128x4xbf16>
    %2 = vector.shape_cast %1 : vector<1x128x4xbf16> to vector<128x4xbf16>
    %cst = arith.constant dense<0.000000e+00> : vector<128x128xf32>
    %3 = tpu.matmul %2, %0, %cst {dimension_numbers = #tpu.dot_dimension_numbers<[1], [0], [0], [1], [0, 0, 1, 1], [], []>} : vector<128x4xbf16>, vector<4x128xbf16>, vector<128x128xf32> -> vector<128x128xf32>
    %c1 = arith.constant 1 : index
    %c0_4 = arith.constant 0 : index
    %c0_5 = arith.constant 0 : index
    %4 = vector.load %arg1[%c1, %c0_4, %c0_5] : memref<9x128x4xbf16, #tpu.memory_space<vmem>>, vector<1x128x4xbf16>
    %5 = vector.shape_cast %4 : vector<1x128x4xbf16> to vector<128x4xbf16>
    %cst_6 = arith.constant dense<0.000000e+00> : vector<128x128xf32>
    %6 = tpu.matmul %5, %0, %cst_6 {dimension_numbers = #tpu.dot_dimension_numbers<[1], [0], [0], [1], [0, 0, 1, 1], [], []>} : vector<128x4xbf16>, vector<4x128xbf16>, vector<128x128xf32> -> vector<128x128xf32>
    %7 = arith.maximumf %3, %6 : vector<128x128xf32>
    %c2 = arith.constant 2 : index
    %c0_7 = arith.constant 0 : index
    %c0_8 = arith.constant 0 : index
    %8 = vector.load %arg1[%c2, %c0_7, %c0_8] : memref<9x128x4xbf16, #tpu.memory_space<vmem>>, vector<1x128x4xbf16>
    %9 = vector.shape_cast %8 : vector<1x128x4xbf16> to vector<128x4xbf16>
    %cst_9 = arith.constant dense<0.000000e+00> : vector<128x128xf32>
    %10 = tpu.matmul %9, %0, %cst_9 {dimension_numbers = #tpu.dot_dimension_numbers<[1], [0], [0], [1], [0, 0, 1, 1], [], []>} : vector<128x4xbf16>, vector<4x128xbf16>, vector<128x128xf32> -> vector<128x128xf32>
    %11 = arith.maximumf %7, %10 : vector<128x128xf32>
    %c3 = arith.constant 3 : index
    %c0_10 = arith.constant 0 : index
    %c0_11 = arith.constant 0 : index
    %12 = vector.load %arg1[%c3, %c0_10, %c0_11] : memref<9x128x4xbf16, #tpu.memory_space<vmem>>, vector<1x128x4xbf16>
    %13 = vector.shape_cast %12 : vector<1x128x4xbf16> to vector<128x4xbf16>
    %cst_12 = arith.constant dense<0.000000e+00> : vector<128x128xf32>
    %14 = tpu.matmul %13, %0, %cst_12 {dimension_numbers = #tpu.dot_dimension_numbers<[1], [0], [0], [1], [0, 0, 1, 1], [], []>} : vector<128x4xbf16>, vector<4x128xbf16>, vector<128x128xf32> -> vector<128x128xf32>
    %15 = arith.maximumf %11, %14 : vector<128x128xf32>
    %c4 = arith.constant 4 : index
    %c0_13 = arith.constant 0 : index
    %c0_14 = arith.constant 0 : index
    %16 = vector.load %arg1[%c4, %c0_13, %c0_14] : memref<9x128x4xbf16, #tpu.memory_space<vmem>>, vector<1x128x4xbf16>
    %17 = vector.shape_cast %16 : vector<1x128x4xbf16> to vector<128x4xbf16>
    %cst_15 = arith.constant dense<0.000000e+00> : vector<128x128xf32>
    %18 = tpu.matmul %17, %0, %cst_15 {dimension_numbers = #tpu.dot_dimension_numbers<[1], [0], [0], [1], [0, 0, 1, 1], [], []>} : vector<128x4xbf16>, vector<4x128xbf16>, vector<128x128xf32> -> vector<128x128xf32>
    %19 = arith.maximumf %15, %18 : vector<128x128xf32>
    %c5 = arith.constant 5 : index
    %c0_16 = arith.constant 0 : index
    %c0_17 = arith.constant 0 : index
    %20 = vector.load %arg1[%c5, %c0_16, %c0_17] : memref<9x128x4xbf16, #tpu.memory_space<vmem>>, vector<1x128x4xbf16>
    %21 = vector.shape_cast %20 : vector<1x128x4xbf16> to vector<128x4xbf16>
    %cst_18 = arith.constant dense<0.000000e+00> : vector<128x128xf32>
    %22 = tpu.matmul %21, %0, %cst_18 {dimension_numbers = #tpu.dot_dimension_numbers<[1], [0], [0], [1], [0, 0, 1, 1], [], []>} : vector<128x4xbf16>, vector<4x128xbf16>, vector<128x128xf32> -> vector<128x128xf32>
    %23 = arith.maximumf %19, %22 : vector<128x128xf32>
    %c6 = arith.constant 6 : index
    %c0_19 = arith.constant 0 : index
    %c0_20 = arith.constant 0 : index
    %24 = vector.load %arg1[%c6, %c0_19, %c0_20] : memref<9x128x4xbf16, #tpu.memory_space<vmem>>, vector<1x128x4xbf16>
    %25 = vector.shape_cast %24 : vector<1x128x4xbf16> to vector<128x4xbf16>
    %cst_21 = arith.constant dense<0.000000e+00> : vector<128x128xf32>
    %26 = tpu.matmul %25, %0, %cst_21 {dimension_numbers = #tpu.dot_dimension_numbers<[1], [0], [0], [1], [0, 0, 1, 1], [], []>} : vector<128x4xbf16>, vector<4x128xbf16>, vector<128x128xf32> -> vector<128x128xf32>
    %27 = arith.maximumf %23, %26 : vector<128x128xf32>
    %c7 = arith.constant 7 : index
    %c0_22 = arith.constant 0 : index
    %c0_23 = arith.constant 0 : index
    %28 = vector.load %arg1[%c7, %c0_22, %c0_23] : memref<9x128x4xbf16, #tpu.memory_space<vmem>>, vector<1x128x4xbf16>
    %29 = vector.shape_cast %28 : vector<1x128x4xbf16> to vector<128x4xbf16>
    %cst_24 = arith.constant dense<0.000000e+00> : vector<128x128xf32>
    %30 = tpu.matmul %29, %0, %cst_24 {dimension_numbers = #tpu.dot_dimension_numbers<[1], [0], [0], [1], [0, 0, 1, 1], [], []>} : vector<128x4xbf16>, vector<4x128xbf16>, vector<128x128xf32> -> vector<128x128xf32>
    %31 = arith.maximumf %27, %30 : vector<128x128xf32>
    %c8 = arith.constant 8 : index
    %c0_25 = arith.constant 0 : index
    %c0_26 = arith.constant 0 : index
    %32 = vector.load %arg1[%c8, %c0_25, %c0_26] : memref<9x128x4xbf16, #tpu.memory_space<vmem>>, vector<1x128x4xbf16>
    %33 = vector.shape_cast %32 : vector<1x128x4xbf16> to vector<128x4xbf16>
    %cst_27 = arith.constant dense<0.000000e+00> : vector<128x128xf32>
    %34 = tpu.matmul %33, %0, %cst_27 {dimension_numbers = #tpu.dot_dimension_numbers<[1], [0], [0], [1], [0, 0, 1, 1], [], []>} : vector<128x4xbf16>, vector<4x128xbf16>, vector<128x128xf32> -> vector<128x128xf32>
    %35 = arith.maximumf %31, %34 : vector<128x128xf32>
    %c0_28 = arith.constant 0 : index
    %c0_29 = arith.constant 0 : index
    %36 = vector.load %arg2[%c0_28, %c0_29] : memref<128x4xbf16, #tpu.memory_space<vmem>>, vector<128x4xbf16>
    %c0_30 = arith.constant 0 : index
    %c0_31 = arith.constant 0 : index
    %37 = vector.load %arg3[%c0_30, %c0_31] : memref<4x128xbf16, #tpu.memory_space<vmem>>, vector<4x128xbf16>
    %cst_32 = arith.constant dense<0.000000e+00> : vector<128x128xf32>
    %38 = tpu.matmul %36, %37, %cst_32 {dimension_numbers = #tpu.dot_dimension_numbers<[1], [0], [0], [1], [0, 0, 1, 1], [], []>} : vector<128x4xbf16>, vector<4x128xbf16>, vector<128x128xf32> -> vector<128x128xf32>
    %39 = arith.addf %35, %38 : vector<128x128xf32>
    %c0_33 = arith.constant 0 : index
    %c0_34 = arith.constant 0 : index
    %40 = vector.load %arg5[%c0_33, %c0_34] : memref<1x128xf32, #tpu.memory_space<vmem>>, vector<1x128xf32>
    %41 = vector.broadcast %40 : vector<1x128xf32> to vector<128x128xf32>
    %42 = arith.addf %39, %41 : vector<128x128xf32>
    %cst_35 = arith.constant 0.000000e+00 : f32
    %43 = vector.broadcast %cst_35 : f32 to vector<128x128xf32>
    %44 = arith.maximumf %42, %43 : vector<128x128xf32>
    %45 = arith.truncf %44 : vector<128x128xf32> to vector<128x128xbf16>
    %c0_36 = arith.constant 0 : index
    %c0_37 = arith.constant 0 : index
    %46 = vector.load %arg6[%c0_36, %c0_37] : memref<128x128xbf16, #tpu.memory_space<vmem>>, vector<128x128xbf16>
    tpu.vector_store %arg6[%c0_36, %c0_37], %45 {strides = array<i32>} : memref<128x128xbf16, #tpu.memory_space<vmem>>, vector<128x128xbf16>,
    return
  }
  func.func @transform_0(%arg0: i32) -> (i32, i32, i32) {
    %c0_i32 = arith.constant 0 : i32
    %c0_i32_0 = arith.constant 0 : i32
    %c0_i32_1 = arith.constant 0 : i32
    return %c0_i32, %arg0, %c0_i32_0 : i32, i32, i32
  }
  func.func @transform_1(%arg0: i32) -> (i32, i32) {
    %c0_i32 = arith.constant 0 : i32
    %c0_i32_0 = arith.constant 0 : i32
    return %arg0, %c0_i32 : i32, i32
  }
  func.func @transform_2(%arg0: i32) -> (i32, i32) {
    %c0_i32 = arith.constant 0 : i32
    %c0_i32_0 = arith.constant 0 : i32
    %c0_i32_1 = arith.constant 0 : i32
    return %c0_i32, %c0_i32_0 : i32, i32
  }
  func.func @transform_3(%arg0: i32) -> (i32, i32) {
    %c0_i32 = arith.constant 0 : i32
    %c0_i32_0 = arith.constant 0 : i32
    %c0_i32_1 = arith.constant 0 : i32
    return %c0_i32, %c0_i32_0 : i32, i32
  }
  func.func @transform_4(%arg0: i32) -> (i32, i32) {
    %c0_i32 = arith.constant 0 : i32
    %c0_i32_0 = arith.constant 0 : i32
    %c0_i32_1 = arith.constant 0 : i32
    return %c0_i32, %c0_i32_0 : i32, i32
  }
  func.func @transform_5(%arg0: i32) -> (i32, i32) {
    %c0_i32 = arith.constant 0 : i32
    %c0_i32_0 = arith.constant 0 : i32
    return %arg0, %c0_i32 : i32, i32
  }
}

</mosaic_0001>

<bundles_post_ra>
// kernel: tpu_custom_call.1
= control target key start
LH: loop header
LB: loop body
LE: loop exit
PB: predicated region body
PF: predicated region fallthrough
CT: control target
= control target key end

     0   :  { %10 = vsyncpa [#allocation4], 0  ;;  %s4725_s0 = inlined_call_operand.vmem [shape: bf16[9,512,4], index: 0, kind: input, shape index: {}]   ;;  %s4726_s1 = inlined_call_operand.vmem [shape: bf16[512,4], index: 1, kind: input, shape index: {}]   ;;  %s4727_s2 = inlined_call_operand.vmem [shape: bf16[4,128], index: 2, kind: input, shape index: {}]   ;;  %s4728_s3 = inlined_call_operand.vmem [shape: bf16[4,128], index: 3, kind: input, shape index: {}]   ;;  %s4729_s4 = inlined_call_operand.vmem [shape: f32[1,128], index: 4, kind: input, shape index: {}]   ;;  %s4730_s5 = inlined_call_operand.hbm [shape: bf16[512,128], index: 5, kind: output, shape index: {}]  }
   0x1   :  { %12 = vsyncpa [#allocation4 + $0x1], 0  ;;  %s3891_s18 = smov 0   ;;  %s3893_s19 = smov 0  }
   0x2   :  { %s3895_s20 = smov 0   ;;  %s3897_s21 = smov 0  }
   0x3 LB: > { %s3912_s22 = sadd.s32 4294967295, %s3856_s21   ;;  %s3007_s23 = sadd.s32 4294967294, %s3856_s21   ;;  %s3856_s21 = sphi %s3897_s21, %s4736_s21   ;;  %s3852_s20 = sphi %s3895_s20, %s4735_s20   ;;  %s3848_s19 = sphi %s3893_s19, %s4734_s19   ;;  %s3844_s18 = sphi %s3891_s18, %s4733_s18  }
   0x4   : > { %s3916_s24 = sadd.s32 1, %s3856_s21   ;;  %s25_s25 = sadd.s32 1, %s3852_s20 }
   0x5   : > { %s22_s26 = ssub.s32 %s3856_s21, %s3916_s24  ;;  %p32_p0 = scmp.ne.s32.totalorder %s3852_s20, %s3848_s19 }
   0x6   : > { %p23_p1 = scmp.eq.s32.totalorder %s22_s26, 0  ;;  %p33_p2 = scmp.eq.s32.totalorder %s3856_s21, 0 }
   0x7   : > { %p151_p3 = scmp.eq.s32.totalorder %s3912_s22, 3  ;;  %p156_p4 = scmp.ne.s32.totalorder %s3848_s19, %s3844_s18 }
   0x8   : > { %s3928_s27 = scalar_select %p23_p1, %s3852_s20, %s25_s25  }
   0x9   : > { %p34_p5 = por %p33_p2, %p32_p0  ;;  %p3930_p6 = por %p151_p3, %p32_p0 }
   0xa   : > { %p157_p7 = scmp.eq.s32.totalorder %s3007_s23, 3  ;;  %p3009_p9 = scmp.ge.s32.totalorder %s3856_s21, 4 }
   0xc   : > { %p3934_p8 = por %p157_p7, %p156_p4  ;;  %182 = sbr.rel (%p3009_p9) target bundleno = 60 (0x3c), region = 28 }
  0x13   : > { %185 = sbr.rel (!%p34_p5) target bundleno = 60 (0x3c), region = 32  ;;  %s187_s30 = sand.u32 (%p34_p5), 1, %s3852_s20  }
  0x14   : > { %s3326_s6 = sshll.u32 (%p34_p5), %s3856_s21, 6  ;;  %s3671_s7 = smul.u32 (%p34_p5), 576, %s187_s30 }
  0x15   : > { %s3944_s10 = scalar_lea.vmem (%p34_p5), %s4725_s0, %s3326_s6 }
  0x16   : > { %v208_v0 = vld [vmem:[%s3944_s10] sm:$0xff] (%p34_p5)   ;;  %v212_v1 = vld [vmem:[%s3944_s10 + $0x8] sm:$0xff] (%p34_p5)   ;;  %v216_v2 = vld [vmem:[%s3944_s10 + $0x10] sm:$0xff] (%p34_p5)   ;;  %s3952_s11 = scalar_lea.vmem (%p34_p5), [#allocation2], %s3671_s7 }
  0x17   : > { %v220_v3 = vld [vmem:[%s3944_s10 + $0x18] sm:$0xff] (%p34_p5)   ;;  %v224_v4 = vld [vmem:[%s3944_s10 + $0x20] sm:$0xff] (%p34_p5)   ;;  %v228_v5 = vld [vmem:[%s3944_s10 + $0x28] sm:$0xff] (%p34_p5)   ;;  %209 = vst [vmem:[%s3952_s11] sm:$0xff] (%p34_p5), %v208_v0  }
  0x18   : > { %213 = vst [vmem:[%s3952_s11 + $0x8] sm:$0xff] (%p34_p5), %v212_v1   ;;  %217 = vst [vmem:[%s3952_s11 + $0x10] sm:$0xff] (%p34_p5), %v216_v2   ;;  %v232_v6 = vld [vmem:[%s3944_s10 + $0x30] sm:$0xff] (%p34_p5)   ;;  %v236_v7 = vld [vmem:[%s3944_s10 + $0x38] sm:$0xff] (%p34_p5)  }
  0x19   : > { %221 = vst [vmem:[%s3952_s11 + $0x18] sm:$0xff] (%p34_p5), %v220_v3   ;;  %225 = vst [vmem:[%s3952_s11 + $0x20] sm:$0xff] (%p34_p5), %v224_v4   ;;  %v240_v8 = vld [vmem:[%s3944_s10 + $0x100] sm:$0xff] (%p34_p5)   ;;  %v244_v9 = vld [vmem:[%s3944_s10 + $0x108] sm:$0xff] (%p34_p5)  }
  0x1a   : > { %229 = vst [vmem:[%s3952_s11 + $0x28] sm:$0xff] %v228_v5   ;;  %233 = vst [vmem:[%s3952_s11 + $0x30] sm:$0xff] %v232_v6   ;;  %v248_v10 = vld [vmem:[%s3944_s10 + $0x110] sm:$0xff]   ;;  %v252_v11 = vld [vmem:[%s3944_s10 + $0x118] sm:$0xff]  }
  0x1b   : > { %237 = vst [vmem:[%s3952_s11 + $0x38] sm:$0xff] %v236_v7   ;;  %241 = vst [vmem:[%s3952_s11 + $0x40] sm:$0xff] %v240_v8   ;;  %v256_v12 = vld [vmem:[%s3944_s10 + $0x120] sm:$0xff]   ;;  %v260_v13 = vld [vmem:[%s3944_s10 + $0x128] sm:$0xff]  }
  0x1c   : > { %245 = vst [vmem:[%s3952_s11 + $0x48] sm:$0xff] %v244_v9   ;;  %249 = vst [vmem:[%s3952_s11 + $0x50] sm:$0xff] %v248_v10   ;;  %v264_v14 = vld [vmem:[%s3944_s10 + $0x130] sm:$0xff]   ;;  %v268_v15 = vld [vmem:[%s3944_s10 + $0x138] sm:$0xff]  }
  0x1d   : > { %253 = vst [vmem:[%s3952_s11 + $0x58] sm:$0xff] %v252_v11   ;;  %257 = vst [vmem:[%s3952_s11 + $0x60] sm:$0xff] %v256_v12   ;;  %v272_v16 = vld [vmem:[%s3944_s10 + $0x200] sm:$0xff]   ;;  %v276_v17 = vld [vmem:[%s3944_s10 + $0x208] sm:$0xff]  }
  0x1e   : > { %261 = vst [vmem:[%s3952_s11 + $0x68] sm:$0xff] %v260_v13   ;;  %265 = vst [vmem:[%s3952_s11 + $0x70] sm:$0xff] %v264_v14   ;;  %v280_v18 = vld [vmem:[%s3944_s10 + $0x210] sm:$0xff]   ;;  %v284_v19 = vld [vmem:[%s3944_s10 + $0x218] sm:$0xff]  }
  0x1f   : > { %269 = vst [vmem:[%s3952_s11 + $0x78] sm:$0xff] %v268_v15   ;;  %273 = vst [vmem:[%s3952_s11 + $0x80] sm:$0xff] %v272_v16   ;;  %v288_v20 = vld [vmem:[%s3944_s10 + $0x220] sm:$0xff]   ;;  %v292_v21 = vld [vmem:[%s3944_s10 + $0x228] sm:$0xff]  }
  0x20   : > { %277 = vst [vmem:[%s3952_s11 + $0x88] sm:$0xff] %v276_v17   ;;  %281 = vst [vmem:[%s3952_s11 + $0x90] sm:$0xff] %v280_v18   ;;  %v296_v22 = vld [vmem:[%s3944_s10 + $0x230] sm:$0xff]   ;;  %v300_v23 = vld [vmem:[%s3944_s10 + $0x238] sm:$0xff]  }
  0x21   : > { %285 = vst [vmem:[%s3952_s11 + $0x98] sm:$0xff] %v284_v19   ;;  %289 = vst [vmem:[%s3952_s11 + $0xa0] sm:$0xff] %v288_v20   ;;  %v304_v24 = vld [vmem:[%s3944_s10 + $0x300] sm:$0xff]   ;;  %v308_v25 = vld [vmem:[%s3944_s10 + $0x308] sm:$0xff]  }
  0x22   : > { %293 = vst [vmem:[%s3952_s11 + $0xa8] sm:$0xff] %v292_v21   ;;  %297 = vst [vmem:[%s3952_s11 + $0xb0] sm:$0xff] %v296_v22   ;;  %v312_v26 = vld [vmem:[%s3944_s10 + $0x310] sm:$0xff]   ;;  %v316_v27 = vld [vmem:[%s3944_s10 + $0x318] sm:$0xff]  }
  0x23   : > { %301 = vst [vmem:[%s3952_s11 + $0xb8] sm:$0xff] %v300_v23   ;;  %305 = vst [vmem:[%s3952_s11 + $0xc0] sm:$0xff] %v304_v24   ;;  %v320_v28 = vld [vmem:[%s3944_s10 + $0x320] sm:$0xff]   ;;  %v324_v29 = vld [vmem:[%s3944_s10 + $0x328] sm:$0xff]  }
  0x24   : > { %309 = vst [vmem:[%s3952_s11 + $0xc8] sm:$0xff] %v308_v25   ;;  %313 = vst [vmem:[%s3952_s11 + $0xd0] sm:$0xff] %v312_v26   ;;  %v328_v30 = vld [vmem:[%s3944_s10 + $0x330] sm:$0xff]   ;;  %v332_v31 = vld [vmem:[%s3944_s10 + $0x338] sm:$0xff]  }
  0x25   : > { %317 = vst [vmem:[%s3952_s11 + $0xd8] sm:$0xff] %v316_v27   ;;  %321 = vst [vmem:[%s3952_s11 + $0xe0] sm:$0xff] %v320_v28   ;;  %v336_v32 = vld [vmem:[%s3944_s10 + $0x400] sm:$0xff]   ;;  %v340_v33 = vld [vmem:[%s3944_s10 + $0x408] sm:$0xff]  }
  0x26   : > { %325 = vst [vmem:[%s3952_s11 + $0xe8] sm:$0xff] %v324_v29   ;;  %329 = vst [vmem:[%s3952_s11 + $0xf0] sm:$0xff] %v328_v30   ;;  %v344_v34 = vld [vmem:[%s3944_s10 + $0x410] sm:$0xff]   ;;  %v348_v35 = vld [vmem:[%s3944_s10 + $0x418] sm:$0xff]  }
  0x27   : > { %333 = vst [vmem:[%s3952_s11 + $0xf8] sm:$0xff] %v332_v31   ;;  %337 = vst [vmem:[%s3952_s11 + $0x100] sm:$0xff] %v336_v32   ;;  %v352_v36 = vld [vmem:[%s3944_s10 + $0x420] sm:$0xff]   ;;  %v356_v37 = vld [vmem:[%s3944_s10 + $0x428] sm:$0xff]  }
  0x28   : > { %341 = vst [vmem:[%s3952_s11 + $0x108] sm:$0xff] %v340_v33   ;;  %345 = vst [vmem:[%s3952_s11 + $0x110] sm:$0xff] %v344_v34   ;;  %v360_v38 = vld [vmem:[%s3944_s10 + $0x430] sm:$0xff]   ;;  %v364_v39 = vld [vmem:[%s3944_s10 + $0x438] sm:$0xff]  }
  0x29   : > { %349 = vst [vmem:[%s3952_s11 + $0x118] sm:$0xff] %v348_v35   ;;  %353 = vst [vmem:[%s3952_s11 + $0x120] sm:$0xff] %v352_v36   ;;  %v368_v40 = vld [vmem:[%s3944_s10 + $0x500] sm:$0xff]   ;;  %v372_v41 = vld [vmem:[%s3944_s10 + $0x508] sm:$0xff]  }
  0x2a   : > { %357 = vst [vmem:[%s3952_s11 + $0x128] sm:$0xff] %v356_v37   ;;  %361 = vst [vmem:[%s3952_s11 + $0x130] sm:$0xff] %v360_v38   ;;  %v376_v42 = vld [vmem:[%s3944_s10 + $0x510] sm:$0xff]   ;;  %v380_v43 = vld [vmem:[%s3944_s10 + $0x518] sm:$0xff]  }
  0x2b   : > { %365 = vst [vmem:[%s3952_s11 + $0x138] sm:$0xff] %v364_v39   ;;  %369 = vst [vmem:[%s3952_s11 + $0x140] sm:$0xff] %v368_v40   ;;  %v384_v44 = vld [vmem:[%s3944_s10 + $0x520] sm:$0xff]   ;;  %v388_v45 = vld [vmem:[%s3944_s10 + $0x528] sm:$0xff]  }
  0x2c   : > { %373 = vst [vmem:[%s3952_s11 + $0x148] sm:$0xff] %v372_v41   ;;  %377 = vst [vmem:[%s3952_s11 + $0x150] sm:$0xff] %v376_v42   ;;  %v392_v46 = vld [vmem:[%s3944_s10 + $0x530] sm:$0xff]   ;;  %v396_v47 = vld [vmem:[%s3944_s10 + $0x538] sm:$0xff]  }
  0x2d   : > { %381 = vst [vmem:[%s3952_s11 + $0x158] sm:$0xff] %v380_v43   ;;  %385 = vst [vmem:[%s3952_s11 + $0x160] sm:$0xff] %v384_v44   ;;  %v400_v48 = vld [vmem:[%s3944_s10 + $0x600] sm:$0xff]   ;;  %v404_v49 = vld [vmem:[%s3944_s10 + $0x608] sm:$0xff]  }
  0x2e   : > { %389 = vst [vmem:[%s3952_s11 + $0x168] sm:$0xff] %v388_v45   ;;  %393 = vst [vmem:[%s3952_s11 + $0x170] sm:$0xff] %v392_v46   ;;  %v408_v50 = vld [vmem:[%s3944_s10 + $0x610] sm:$0xff]   ;;  %v412_v51 = vld [vmem:[%s3944_s10 + $0x618] sm:$0xff]  }
  0x2f   : > { %397 = vst [vmem:[%s3952_s11 + $0x178] sm:$0xff] %v396_v47   ;;  %401 = vst [vmem:[%s3952_s11 + $0x180] sm:$0xff] %v400_v48   ;;  %v416_v52 = vld [vmem:[%s3944_s10 + $0x620] sm:$0xff]   ;;  %v420_v53 = vld [vmem:[%s3944_s10 + $0x628] sm:$0xff]  }
  0x30   : > { %405 = vst [vmem:[%s3952_s11 + $0x188] sm:$0xff] %v404_v49   ;;  %409 = vst [vmem:[%s3952_s11 + $0x190] sm:$0xff] %v408_v50   ;;  %v424_v54 = vld [vmem:[%s3944_s10 + $0x630] sm:$0xff]   ;;  %v428_v55 = vld [vmem:[%s3944_s10 + $0x638] sm:$0xff]  }
  0x31   : > { %413 = vst [vmem:[%s3952_s11 + $0x198] sm:$0xff] %v412_v51   ;;  %417 = vst [vmem:[%s3952_s11 + $0x1a0] sm:$0xff] %v416_v52   ;;  %v432_v56 = vld [vmem:[%s3944_s10 + $0x700] sm:$0xff]   ;;  %v436_v57 = vld [vmem:[%s3944_s10 + $0x708] sm:$0xff]  }
  0x32   : > { %421 = vst [vmem:[%s3952_s11 + $0x1a8] sm:$0xff] %v420_v53   ;;  %425 = vst [vmem:[%s3952_s11 + $0x1b0] sm:$0xff] %v424_v54   ;;  %v440_v58 = vld [vmem:[%s3944_s10 + $0x710] sm:$0xff]   ;;  %v444_v59 = vld [vmem:[%s3944_s10 + $0x718] sm:$0xff]  }
  0x33   : > { %429 = vst [vmem:[%s3952_s11 + $0x1b8] sm:$0xff] %v428_v55   ;;  %433 = vst [vmem:[%s3952_s11 + $0x1c0] sm:$0xff] %v432_v56   ;;  %v448_v60 = vld [vmem:[%s3944_s10 + $0x720] sm:$0xff]   ;;  %v452_v61 = vld [vmem:[%s3944_s10 + $0x728] sm:$0xff]  }
  0x34   : > { %437 = vst [vmem:[%s3952_s11 + $0x1c8] sm:$0xff] %v436_v57   ;;  %441 = vst [vmem:[%s3952_s11 + $0x1d0] sm:$0xff] %v440_v58   ;;  %v456_v62 = vld [vmem:[%s3944_s10 + $0x730] sm:$0xff]   ;;  %v460_v63 = vld [vmem:[%s3944_s10 + $0x738] sm:$0xff]  }
  0x35   : > { %445 = vst [vmem:[%s3952_s11 + $0x1d8] sm:$0xff] %v444_v59   ;;  %449 = vst [vmem:[%s3952_s11 + $0x1e0] sm:$0xff] %v448_v60   ;;  %v464_v0 = vld [vmem:[%s3944_s10 + $0x800] sm:$0xff]   ;;  %v468_v1 = vld [vmem:[%s3944_s10 + $0x808] sm:$0xff]  }
  0x36   : > { %453 = vst [vmem:[%s3952_s11 + $0x1e8] sm:$0xff] %v452_v61   ;;  %457 = vst [vmem:[%s3952_s11 + $0x1f0] sm:$0xff] %v456_v62   ;;  %v472_v2 = vld [vmem:[%s3944_s10 + $0x810] sm:$0xff]   ;;  %v476_v3 = vld [vmem:[%s3944_s10 + $0x818] sm:$0xff]  }
  0x37   : > { %461 = vst [vmem:[%s3952_s11 + $0x1f8] sm:$0xff] %v460_v63   ;;  %465 = vst [vmem:[%s3952_s11 + $0x200] sm:$0xff] %v464_v0   ;;  %v480_v4 = vld [vmem:[%s3944_s10 + $0x820] sm:$0xff]   ;;  %v484_v5 = vld [vmem:[%s3944_s10 + $0x828] sm:$0xff]  }
  0x38   : > { %469 = vst [vmem:[%s3952_s11 + $0x208] sm:$0xff] %v468_v1   ;;  %473 = vst [vmem:[%s3952_s11 + $0x210] sm:$0xff] %v472_v2   ;;  %v488_v6 = vld [vmem:[%s3944_s10 + $0x830] sm:$0xff]   ;;  %v492_v7 = vld [vmem:[%s3944_s10 + $0x838] sm:$0xff]  }
  0x39   : > { %477 = vst [vmem:[%s3952_s11 + $0x218] sm:$0xff] %v476_v3   ;;  %481 = vst [vmem:[%s3952_s11 + $0x220] sm:$0xff] %v480_v4  }
  0x3a   : > { %485 = vst [vmem:[%s3952_s11 + $0x228] sm:$0xff] %v484_v5   ;;  %489 = vst [vmem:[%s3952_s11 + $0x230] sm:$0xff] %v488_v6  }
  0x3b   : > { %493 = vst [vmem:[%s3952_s11 + $0x238] sm:$0xff] %v492_v7  }
  0x3c PF: > { %p3012_p10 = scmp.ge.s32.totalorder %s3856_s21, 1  ;;  %p814_p11 = scmp.lt.s32.totalorder %s3856_s21, 5 }
  0x3e   : > { %p815_p12 = pnand %p3012_p10, %p814_p11 }
  0x3f   : > { %v4097_v8 = vld [vmem:[%s4728_s3] sm:$0x3] (!%p815_p12)  ;;  %vm944_vm0 = vcmask (!%p815_p12), 1041408   ;;  %s4100_s14 = sand.u32 (!%p815_p12), 1, %s3848_s19   ;;  %vm919_vm1 = vcmask (!%p815_p12), 31744   ;;  %s3014_s17 = sshll.u32 (!%p815_p12), %s3912_s22, 4 }
  0x40   : > { %818 = sbr.rel (%p815_p12) target bundleno = 462 (0x1ce), region = 77  ;;  %3661 = vmatprep.subr.msk.bf16.mxu0 (!%p815_p12), %vm944_vm0, %v4097_v8  ;;  %v4106_v9 = vsel (!%p815_p12), %vm944_vm0, %v4097_v8, 0  ;;  %3662 = vmatprep.subr.msk.bf16.mxu1 (!%p815_p12), %vm944_vm0, %v4097_v8  ;;  %p855_p13 = scmp.lt.s32.totalorder (!%p815_p12), %s3014_s17, 63  ;;  %v2613_v48 = vld [vmem:[%s4727_s2] sm:$0x3] (!%p815_p12) }
  0x41   : > { %s3672_s15 = smul.u32 (!%p815_p12), 576, %s4100_s14  ;;  %3482 = vmatpush3.bf16.msra.mxu0 (!%p815_p12), %v4106_v9  ;;  %3500 = vmatpush3.bf16.msra.mxu1 (!%p815_p12), %v4106_v9  ;;  %v2679_v0 = vsel (!%p815_p12), %vm944_vm0, %v2613_v48, 0  ;;  %s3013_s10 = sshll.u32 (!%p815_p12), %s4100_s14, 6 }
  0x42   : > { %3663 = vmatprep.subr.msk.bf16.mxu0 (!%p815_p12), %vm944_vm0, %v4097_v8  ;;  %3664 = vmatprep.subr.msk.bf16.mxu1 (!%p815_p12), %vm944_vm0, %v4097_v8  ;;  %s4629_s11 = scalar_lea.vmem (!%p815_p12), [#allocation3], %s3013_s10  ;;  %s3343_s12 = sshll.u32 (!%p815_p12), %s3912_s22, 10 }
  0x43   : > { %s4117_s16 = scalar_lea.vmem (!%p815_p12), [#allocation2], %s3672_s15  ;;  %s2927_s13 = sshll.u32 (!%p815_p12), %s4629_s11, 4  ;;  %s4680_s13 = int_to_ptr.vmem [resolvable:$true] %s2927_s13 }
  0x44   : > { %v3714_v10 = vld [vmem:[%s4117_s16] sm:$0xff] (!%p815_p12)   ;;  %v3716_v12 = vld [vmem:[%s4117_s16 + $0x8] sm:$0xff] (!%p815_p12)   ;;  %v3718_v14 = vld [vmem:[%s4117_s16 + $0x10] sm:$0xff] (!%p815_p12)   ;;  %s2914_s22 = scalar_lea.sflag (!%p815_p12), [#allocation4], %s4100_s14  ;;  %s3858_s25 = smov (!%p815_p12), [#allocation3]  }
  0x45   : > { %v3715_v11 = vld [vmem:[%s4117_s16 + $0x40] sm:$0xff] (!%p815_p12)   ;;  %3483 = vmatprep.mubr.msk.bf16.mxu0 (!%p815_p12), %vm919_vm1, %v3714_v10  ;;  %v3717_v13 = vld [vmem:[%s4117_s16 + $0x48] sm:$0xff] (!%p815_p12)   ;;  %v3719_v15 = vld [vmem:[%s4117_s16 + $0x50] sm:$0xff] (!%p815_p12)   ;;  %s3798_s26 = sshll.u32 (!%p815_p12), %s3858_s25, 4  ;;  %s3799_s26 = int_to_ptr.vmem [resolvable:$false] %s3798_s26 }
  0x46   : > { %3501 = vmatprep.mubr.msk.bf16.mxu1 (!%p815_p12), %vm919_vm1, %v3715_v11  ;;  %3484 = vmatmul.mubr.msk.bf16.vlgmr.msra.gmra.mrb[0].mxu0 (!%p815_p12), %vm919_vm1, %v3716_v12  ;;  %v3720_v16 = vld [vmem:[%s4117_s16 + $0x18] sm:$0xff] (!%p815_p12)   ;;  %v3722_v18 = vld [vmem:[%s4117_s16 + $0x20] sm:$0xff] (!%p815_p12)   ;;  %v3724_v20 = vld [vmem:[%s4117_s16 + $0x28] sm:$0xff] (!%p815_p12)   ;;  %p3801_p3 = scmp.lt.s32.totalorder (!%p815_p12), %s4680_s13, %s3799_s26 }
  0x47   : > { %3502 = vmatmul.mubr.msk.bf16.vlgmr.msra.gmra.mrb[0].mxu1 %vm919_vm1, %v3717_v13  ;;  %3518 = vmatpush3.bf16.msra.mxu0 %v4106_v9  ;;  %v3721_v17 = vld [vmem:[%s4117_s16 + $0x58] sm:$0xff]   ;;  %v3723_v19 = vld [vmem:[%s4117_s16 + $0x60] sm:$0xff]   ;;  %v3725_v21 = vld [vmem:[%s4117_s16 + $0x68] sm:$0xff]   ;;  %s4738_s17 = smov (!%p855_p13, %s3014_s17), 63 }
  0x48   : > { %3536 = vmatpush3.bf16.msra.mxu1 %v4106_v9  ;;  %3487 = vmatprep.mubr.msk.bf16.mxu0 %vm919_vm1, %v3718_v14  ;;  %v3726_v22 = vld [vmem:[%s4117_s16 + $0x30] sm:$0xff]   ;;  %v3728_v24 = vld [vmem:[%s4117_s16 + $0x38] sm:$0xff]   ;;  %v3730_v26 = vld [vmem:[%s4117_s16 + $0x80] sm:$0xff]   ;;  %s3015_s23 = sshll.u32 %s4738_s17, 2  ;;  %s4678_s17 = scalar_lea.hbm %s4730_s5, %s3343_s12 }
  0x49   : > { %3505 = vmatprep.mubr.msk.bf16.mxu1 %vm919_vm1, %v3719_v15  ;;  %3665 = vmatprep.subr.msk.bf16.mxu0 %vm944_vm0, %v4097_v8  ;;  %v3727_v23 = vld [vmem:[%s4117_s16 + $0x70] sm:$0xff]   ;;  %v3729_v25 = vld [vmem:[%s4117_s16 + $0x78] sm:$0xff]   ;;  %v3731_v27 = vld [vmem:[%s4117_s16 + $0xc0] sm:$0xff]   ;;  %s4204_s30 = scalar_lea.vmem %s4726_s1, %s3015_s23  ;;  %s3794_s23 = scalar_lea.vmem %s4680_s13, 1024 }
  0x4a   : > { %3666 = vmatprep.subr.msk.bf16.mxu1 %vm944_vm0, %v4097_v8  ;;  %v3732_v28 = vld [vmem:[%s4117_s16 + $0x88] sm:$0xff]   ;;  %v3734_v30 = vld [vmem:[%s4117_s16 + $0x90] sm:$0xff]   ;;  %v3736_v32 = vld [vmem:[%s4117_s16 + $0x98] sm:$0xff]   ;;  %p3795_p0 = scmp.ne.s32.totalorder %s4680_s13, %s3794_s23 }
  0x4b   : > { %v3733_v29 = vld [vmem:[%s4117_s16 + $0xc8] sm:$0xff]   ;;  %v3735_v31 = vld [vmem:[%s4117_s16 + $0xd0] sm:$0xff]   ;;  %v3737_v33 = vld [vmem:[%s4117_s16 + $0xd8] sm:$0xff]  }
  0x4c   : > { %v3738_v34 = vld [vmem:[%s4117_s16 + $0xa0] sm:$0xff]   ;;  %v3740_v36 = vld [vmem:[%s4117_s16 + $0xa8] sm:$0xff]   ;;  %v3742_v38 = vld [vmem:[%s4117_s16 + $0xb0] sm:$0xff]   ;;  %p3796_p1 = pnand %p3795_p0, %p3930_p6 }
  0x4d   : > { %v3739_v35 = vld [vmem:[%s4117_s16 + $0xe0] sm:$0xff]   ;;  %v3741_v37 = vld [vmem:[%s4117_s16 + $0xe8] sm:$0xff]   ;;  %v3743_v39 = vld [vmem:[%s4117_s16 + $0xf0] sm:$0xff]  }
  0x4e   : > { %3488 = vmatmul.mubr.msk.bf16.gmra.mrb[4].mxu0 %vm919_vm1, %v3720_v16  ;;  %v3744_v40 = vld [vmem:[%s4117_s16 + $0xb8] sm:$0xff]   ;;  %v3746_v42 = vld [vmem:[%s4117_s16 + $0x100] sm:$0xff]   ;;  %v3748_v44 = vld [vmem:[%s4117_s16 + $0x108] sm:$0xff]   ;;  %p3797_p2 = pneg %p3796_p1 }
  0x4f   : > { %3506 = vmatmul.mubr.msk.bf16.gmra.mrb[4].mxu1 %vm919_vm1, %v3721_v17  ;;  %3491 = vmatprep.mubr.msk.bf16.mxu0 %vm919_vm1, %v3722_v18  ;;  %v3745_v41 = vld [vmem:[%s4117_s16 + $0xf8] sm:$0xff]   ;;  %v3747_v43 = vld [vmem:[%s4117_s16 + $0x140] sm:$0xff]   ;;  %v3749_v45 = vld [vmem:[%s4117_s16 + $0x148] sm:$0xff]  }
  0x50   : > { %3509 = vmatprep.mubr.msk.bf16.mxu1 %vm919_vm1, %v3723_v19  ;;  %v3750_v46 = vld [vmem:[%s4117_s16 + $0x110] sm:$0xff]   ;;  %v3752_v49 = vld [vmem:[%s4117_s16 + $0x118] sm:$0xff]   ;;  %v3754_v51 = vld [vmem:[%s4117_s16 + $0x120] sm:$0xff]  }
  0x51   : > { %v3751_v47 = vld [vmem:[%s4117_s16 + $0x150] sm:$0xff]   ;;  %v3753_v50 = vld [vmem:[%s4117_s16 + $0x158] sm:$0xff]   ;;  %v3755_v52 = vld [vmem:[%s4117_s16 + $0x160] sm:$0xff]  }
  0x52   : > { %v3756_v53 = vld [vmem:[%s4117_s16 + $0x128] sm:$0xff]   ;;  %v3758_v55 = vld [vmem:[%s4117_s16 + $0x130] sm:$0xff]   ;;  %v3760_v57 = vld [vmem:[%s4117_s16 + $0x138] sm:$0xff]  }
  0x53   : > { %v3757_v54 = vld [vmem:[%s4117_s16 + $0x168] sm:$0xff]   ;;  %v3759_v56 = vld [vmem:[%s4117_s16 + $0x170] sm:$0xff]   ;;  %v3761_v58 = vld [vmem:[%s4117_s16 + $0x178] sm:$0xff]  }
  0x54   : > { %v3762_v59 = vld [vmem:[%s4117_s16 + $0x180] sm:$0xff]   ;;  %v3764_v61 = vld [vmem:[%s4117_s16 + $0x188] sm:$0xff]   ;;  %v3766_v63 = vld [vmem:[%s4117_s16 + $0x190] sm:$0xff]  }
  0x55   : > { %v3763_v60 = vld [vmem:[%s4117_s16 + $0x1c0] sm:$0xff]   ;;  %v3765_v62 = vld [vmem:[%s4117_s16 + $0x1c8] sm:$0xff]   ;;  %v3767_v1 = vld [vmem:[%s4117_s16 + $0x1d0] sm:$0xff]  }
  0x56   : > { %3492 = vmatmul.mubr.msk.bf16.gmra.mrb[8].mxu0 %vm919_vm1, %v3724_v20  ;;  %v3768_v2 = vld [vmem:[%s4117_s16 + $0x198] sm:$0xff]   ;;  %v3770_v4 = vld [vmem:[%s4117_s16 + $0x1a0] sm:$0xff]   ;;  %v3772_v6 = vld [vmem:[%s4117_s16 + $0x1a8] sm:$0xff]  }
  0x57   : > { %3510 = vmatmul.mubr.msk.bf16.gmra.mrb[8].mxu1 %vm919_vm1, %v3725_v21  ;;  %3495 = vmatprep.mubr.msk.bf16.mxu0 %vm919_vm1, %v3726_v22  ;;  %v3769_v3 = vld [vmem:[%s4117_s16 + $0x1d8] sm:$0xff]   ;;  %v3771_v5 = vld [vmem:[%s4117_s16 + $0x1e0] sm:$0xff]   ;;  %v3773_v7 = vld [vmem:[%s4117_s16 + $0x1e8] sm:$0xff]  }
  0x58   : > { %3513 = vmatprep.mubr.msk.bf16.mxu1 %vm919_vm1, %v3727_v23  ;;  %v3776_v10 = vld [vmem:[%s4117_s16 + $0x1b8] sm:$0xff]   ;;  %v3778_v12 = vld [vmem:[%s4117_s16 + $0x200] sm:$0xff]   ;;  %v3780_v14 = vld [vmem:[%s4117_s16 + $0x208] sm:$0xff]  }
  0x59   : > { %v3777_v11 = vld [vmem:[%s4117_s16 + $0x1f8] sm:$0xff]   ;;  %v3779_v13 = vld [vmem:[%s4204_s30] sm:$0xff]   ;;  %v3781_v15 = vld [vmem:[%s4204_s30 + $0x8] sm:$0xff]  }
  0x5a   : > { %v3782_v16 = vld [vmem:[%s4117_s16 + $0x210] sm:$0xff]   ;;  %v3784_v18 = vld [vmem:[%s4117_s16 + $0x218] sm:$0xff]   ;;  %v3786_v20 = vld [vmem:[%s4117_s16 + $0x220] sm:$0xff]  }
  0x5b   : > { %v3783_v17 = vld [vmem:[%s4204_s30 + $0x10] sm:$0xff]   ;;  %v3785_v19 = vld [vmem:[%s4204_s30 + $0x18] sm:$0xff]   ;;  %v3787_v21 = vld [vmem:[%s4204_s30 + $0x20] sm:$0xff]  }
  0x5c   : > { %v3788_v22 = vld [vmem:[%s4117_s16 + $0x228] sm:$0xff]  }
  0x5d   : > { %v3789_v23 = vld [vmem:[%s4204_s30 + $0x28] sm:$0xff]  }
  0x5e   : > { %3496 = vmatmul.mubr.msk.bf16.gmra.mrb[12].mxu0 %vm919_vm1, %v3728_v24  ;;  %v3790_v24 = vld [vmem:[%s4117_s16 + $0x230] sm:$0xff]  }
  0x5f   : > { %3514 = vmatmul.mubr.msk.bf16.gmra.mrb[12].mxu1 %vm919_vm1, %v3729_v25  ;;  %3519 = vmatprep.mubr.msk.bf16.mxu0 %vm919_vm1, %v3730_v26  ;;  %v3791_v25 = vld [vmem:[%s4204_s30 + $0x30] sm:$0xff]   ;;  %v3792_v26 = vld [vmem:[%s4117_s16 + $0x238] sm:$0xff]  }
  0x60   : > { %3537 = vmatprep.mubr.msk.bf16.mxu1 %vm919_vm1, %v3731_v27  ;;  %v3793_v27 = vld [vmem:[%s4204_s30 + $0x38] sm:$0xff]   ;;  %s3800_s30 = scalar_lea.vmem %s3799_s26, 2048 }
  0x61   : > { %p3802_p4 = scmp.lt.s32.totalorder %s3800_s30, %s3794_s23 }
  0x63   : > { %p3803_p5 = por %p3802_p4, %p3801_p3 }
  0x65   : > { %p3804_p7 = pnand %p3803_p5, %p3797_p2 }
  0x66   : > { %3520 = vmatmul.mubr.msk.bf16.vlgmr.msra.gmra.mrb[16].mxu0 %vm919_vm1, %v3732_v28 }
  0x67   : > { %3538 = vmatmul.mubr.msk.bf16.vlgmr.msra.gmra.mrb[16].mxu1 %vm919_vm1, %v3733_v29  ;;  %3554 = vmatpush3.bf16.msra.mxu0 %v4106_v9 }
  0x68   : > { %3572 = vmatpush3.bf16.msra.mxu1 %v4106_v9  ;;  %3523 = vmatprep.mubr.msk.bf16.mxu0 %vm919_vm1, %v3734_v30 }
  0x69   : > { %3541 = vmatprep.mubr.msk.bf16.mxu1 %vm919_vm1, %v3735_v31  ;;  %3667 = vmatprep.subr.msk.bf16.mxu0 %vm944_vm0, %v4097_v8 }
  0x6a   : > { %3668 = vmatprep.subr.msk.bf16.mxu1 %vm944_vm0, %v4097_v8 }
  0x6e   : > { %3524 = vmatmul.mubr.msk.bf16.gmra.mrb[20].mxu0 %vm919_vm1, %v3736_v32 }
  0x6f   : > { %3542 = vmatmul.mubr.msk.bf16.gmra.mrb[20].mxu1 %vm919_vm1, %v3737_v33  ;;  %3527 = vmatprep.mubr.msk.bf16.mxu0 %vm919_vm1, %v3738_v34 }
  0x70   : > { %3545 = vmatprep.mubr.msk.bf16.mxu1 %vm919_vm1, %v3739_v35 }
  0x76   : > { %3528 = vmatmul.mubr.msk.bf16.gmra.mrb[24].mxu0 %vm919_vm1, %v3740_v36 }
  0x77   : > { %3546 = vmatmul.mubr.msk.bf16.gmra.mrb[24].mxu1 %vm919_vm1, %v3741_v37  ;;  %3531 = vmatprep.mubr.msk.bf16.mxu0 %vm919_vm1, %v3742_v38 }
  0x78   : > { %3549 = vmatprep.mubr.msk.bf16.mxu1 %vm919_vm1, %v3743_v39 }
  0x7e   : > { %3532 = vmatmul.mubr.msk.bf16.gmra.mrb[28].mxu0 %vm919_vm1, %v3744_v40 }
  0x7f   : > { %3550 = vmatmul.mubr.msk.bf16.gmra.mrb[28].mxu1 %vm919_vm1, %v3745_v41  ;;  %3555 = vmatprep.mubr.msk.bf16.mxu0 %vm919_vm1, %v3746_v42 }
  0x80   : > { %3573 = vmatprep.mubr.msk.bf16.mxu1 %vm919_vm1, %v3747_v43 }
  0x86   : > { %3556 = vmatmul.mubr.msk.bf16.vlgmr.msra.gmra.mrb[32].mxu0 %vm919_vm1, %v3748_v44 }
  0x87   : > { %3574 = vmatmul.mubr.msk.bf16.vlgmr.msra.gmra.mrb[32].mxu1 %vm919_vm1, %v3749_v45  ;;  %3590 = vmatpush3.bf16.msra.mxu0 %v4106_v9 }
  0x88   : > { %3608 = vmatpush3.bf16.msra.mxu1 %v4106_v9  ;;  %3559 = vmatprep.mubr.msk.bf16.mxu0 %vm919_vm1, %v3750_v46 }
  0x89   : > { %3577 = vmatprep.mubr.msk.bf16.mxu1 %vm919_vm1, %v3751_v47  ;;  %3669 = vmatprep.subr.msk.bf16.mxu0 %vm944_vm0, %v4097_v8  ;;  %v3774_v8 = vld [vmem:[%s4117_s16 + $0x1b0] sm:$0xff]  }
  0x8a   : > { %3670 = vmatprep.subr.msk.bf16.mxu1 %vm944_vm0, %v2613_v48 }
  0x8e   : > { %3560 = vmatmul.mubr.msk.bf16.gmra.mrb[36].mxu0 %vm919_vm1, %v3752_v49 }
  0x8f   : > { %3578 = vmatmul.mubr.msk.bf16.gmra.mrb[36].mxu1 %vm919_vm1, %v3753_v50  ;;  %3563 = vmatprep.mubr.msk.bf16.mxu0 %vm919_vm1, %v3754_v51 }
  0x90   : > { %3581 = vmatprep.mubr.msk.bf16.mxu1 %vm919_vm1, %v3755_v52 }
  0x96   : > { %3564 = vmatmul.mubr.msk.bf16.gmra.mrb[40].mxu0 %vm919_vm1, %v3756_v53 }
  0x97   : > { %3582 = vmatmul.mubr.msk.bf16.gmra.mrb[40].mxu1 %vm919_vm1, %v3757_v54  ;;  %3567 = vmatprep.mubr.msk.bf16.mxu0 %vm919_vm1, %v3758_v55 }
  0x98   : > { %3585 = vmatprep.mubr.msk.bf16.mxu1 %vm919_vm1, %v3759_v56 }
  0x9e   : > { %3568 = vmatmul.mubr.msk.bf16.gmra.mrb[44].mxu0 %vm919_vm1, %v3760_v57 }
  0x9f   : > { %3586 = vmatmul.mubr.msk.bf16.gmra.mrb[44].mxu1 %vm919_vm1, %v3761_v58  ;;  %3591 = vmatprep.mubr.msk.bf16.mxu0 %vm919_vm1, %v3762_v59 }
  0xa0   : > { %3609 = vmatprep.mubr.msk.bf16.mxu1 %vm919_vm1, %v3763_v60 }
  0xa6   : > { %3592 = vmatmul.mubr.msk.bf16.vlgmr.msra.gmra.mrb[48].mxu0 %vm919_vm1, %v3764_v61 }
  0xa7   : > { %3610 = vmatmul.mubr.msk.bf16.vlgmr.msra.gmra.mrb[48].mxu1 %vm919_vm1, %v3765_v62  ;;  %3626 = vmatpush3.bf16.msra.mxu0 %v4106_v9  ;;  %v3775_v9 = vld [vmem:[%s4117_s16 + $0x1f0] sm:$0xff]  }
  0xa8   : > { %3644 = vmatpush3.bf16.msra.mxu1 %v2679_v0  ;;  %3595 = vmatprep.mubr.msk.bf16.mxu0 %vm919_vm1, %v3766_v63 }
  0xa9   : > { %3613 = vmatprep.mubr.msk.bf16.mxu1 %vm919_vm1, %v3767_v1 }
  0xae   : > { %3596 = vmatmul.mubr.msk.bf16.gmra.mrb[52].mxu0 %vm919_vm1, %v3768_v2 }
  0xaf   : > { %3614 = vmatmul.mubr.msk.bf16.gmra.mrb[52].mxu1 %vm919_vm1, %v3769_v3  ;;  %3599 = vmatprep.mubr.msk.bf16.mxu0 %vm919_vm1, %v3770_v4 }
  0xb0   : > { %3617 = vmatprep.mubr.msk.bf16.mxu1 %vm919_vm1, %v3771_v5 }
  0xb6   : > { %3600 = vmatmul.mubr.msk.bf16.gmra.mrb[56].mxu0 %vm919_vm1, %v3772_v6 }
  0xb7   : > { %3618 = vmatmul.mubr.msk.bf16.gmra.mrb[56].mxu1 %vm919_vm1, %v3773_v7  ;;  %3603 = vmatprep.mubr.msk.bf16.mxu0 %vm919_vm1, %v3774_v8 }
  0xb8   : > { %3621 = vmatprep.mubr.msk.bf16.mxu1 %vm919_vm1, %v3775_v9 }
  0xbe   : > { %3604 = vmatmul.mubr.msk.bf16.gmra.mrb[60].mxu0 %vm919_vm1, %v3776_v10 }
  0xbf   : > { %3622 = vmatmul.mubr.msk.bf16.gmra.mrb[60].mxu1 %vm919_vm1, %v3777_v11  ;;  %3627 = vmatprep.mubr.msk.bf16.mxu0 %vm919_vm1, %v3778_v12 }
  0xc0   : > { %3645 = vmatprep.mubr.msk.bf16.mxu1 %vm919_vm1, %v3779_v13 }
  0xc6   : > { %3628 = vmatmul.mubr.msk.bf16.vlgmr.msra.gmra.mrb[64].mxu0 %vm919_vm1, %v3780_v14 }
  0xc7   : > { %3646 = vmatmul.mubr.msk.bf16.vlgmr.msra.gmra.mrb[64].mxu1 %vm919_vm1, %v3781_v15  ;;  %3631 = vmatprep.mubr.msk.bf16.mxu0 %vm919_vm1, %v3782_v16 }
  0xc8   : > { %3649 = vmatprep.mubr.msk.bf16.mxu1 %vm919_vm1, %v3783_v17 }
  0xce   : > { %3632 = vmatmul.mubr.msk.bf16.gmra.mrb[68].mxu0 %vm919_vm1, %v3784_v18 }
  0xcf   : > { %3650 = vmatmul.mubr.msk.bf16.gmra.mrb[68].mxu1 %vm919_vm1, %v3785_v19  ;;  %3635 = vmatprep.mubr.msk.bf16.mxu0 %vm919_vm1, %v3786_v20 }
  0xd0   : > { %3653 = vmatprep.mubr.msk.bf16.mxu1 %vm919_vm1, %v3787_v21 }
  0xd6   : > { %3636 = vmatmul.mubr.msk.bf16.gmra.mrb[72].mxu0 %vm919_vm1, %v3788_v22 }
  0xd7   : > { %3654 = vmatmul.mubr.msk.bf16.gmra.mrb[72].mxu1 %vm919_vm1, %v3789_v23  ;;  %3639 = vmatprep.mubr.msk.bf16.mxu0 %vm919_vm1, %v3790_v24 }
  0xd8   : > { %3657 = vmatprep.mubr.msk.bf16.mxu1 %vm919_vm1, %v3791_v25 }
  0xde   : > { %3640 = vmatmul.mubr.msk.bf16.gmra.mrb[76].mxu0 %vm919_vm1, %v3792_v26 }
  0xdf   : > { %3658 = vmatmul.mubr.msk.bf16.gmra.mrb[76].mxu1 %vm919_vm1, %v3793_v27 }
 0x119   : > { %v3485_v28 = vpop.f32.mrb[0].mxu0 }
 0x11a   : > { %v3503_v29 = vpop.f32.mrb[0].mxu1  ;;  %v982_v30 = vpop.f32.mrb[1].mxu0 }
 0x11b   : > { %v1225_v31 = vmax.f32 %v3485_v28, %v3503_v29  ;;  %v1160_v32 = vpop.f32.mrb[1].mxu1  ;;  %v3486_v33 = vpop.f32.mrb[2].mxu0 }
 0x11c   : > { %v1223_v34 = vmax.f32 %v982_v30, %v1160_v32  ;;  %v3504_v35 = vpop.f32.mrb[2].mxu1  ;;  %v985_v36 = vpop.f32.mrb[3].mxu0 }
 0x11d   : > { %v1226_v37 = vmax.f32 %v3486_v33, %v3504_v35  ;;  %v1163_v38 = vpop.f32.mrb[3].mxu1 }
 0x11e   : > { %v1224_v39 = vmax.f32 %v985_v36, %v1163_v38 }
 0x121   : > { %v3489_v40 = vpop.f32.mrb[4].mxu0 }
 0x122   : > { %v3507_v41 = vpop.f32.mrb[4].mxu1  ;;  %v998_v42 = vpop.f32.mrb[5].mxu0 }
 0x123   : > { %v1229_v43 = vmax.f32 %v3489_v40, %v3507_v41  ;;  %v1176_v44 = vpop.f32.mrb[5].mxu1  ;;  %v3490_v45 = vpop.f32.mrb[6].mxu0 }
 0x124   : > { %v1227_v46 = vmax.f32 %v998_v42, %v1176_v44  ;;  %v3508_v47 = vpop.f32.mrb[6].mxu1  ;;  %v1001_v48 = vpop.f32.mrb[7].mxu0 }
 0x125   : > { %v1230_v49 = vmax.f32 %v3490_v45, %v3508_v47  ;;  %v1179_v50 = vpop.f32.mrb[7].mxu1 }
 0x126   : > { %v1228_v51 = vmax.f32 %v1001_v48, %v1179_v50 }
 0x129   : > { %v3493_v52 = vpop.f32.mrb[8].mxu0 }
 0x12a   : > { %v3511_v53 = vpop.f32.mrb[8].mxu1  ;;  %v1014_v54 = vpop.f32.mrb[9].mxu0 }
 0x12b   : > { %v1233_v55 = vmax.f32 %v3493_v52, %v3511_v53  ;;  %v1192_v56 = vpop.f32.mrb[9].mxu1  ;;  %v3494_v57 = vpop.f32.mrb[10].mxu0 }
 0x12c   : > { %v1231_v58 = vmax.f32 %v1014_v54, %v1192_v56  ;;  %v3512_v59 = vpop.f32.mrb[10].mxu1  ;;  %v1017_v60 = vpop.f32.mrb[11].mxu0 }
 0x12d   : > { %v1234_v61 = vmax.f32 %v3494_v57, %v3512_v59  ;;  %v1195_v62 = vpop.f32.mrb[11].mxu1 }
 0x12e   : > { %v1232_v63 = vmax.f32 %v1017_v60, %v1195_v62 }
 0x131   : > { %v3497_v0 = vpop.f32.mrb[12].mxu0 }
 0x132   : > { %v3515_v1 = vpop.f32.mrb[12].mxu1  ;;  %v4307_v2 = vpop.f32.mrb[13].mxu0 }
 0x133   : > { %v1237_v3 = vmax.f32 %v3497_v0, %v3515_v1  ;;  %v1208_v4 = vpop.f32.mrb[13].mxu1  ;;  %v4309_v5 = vpop.f32.mrb[14].mxu0 }
 0x134   : > { %v1235_v6 = vmax.f32 %v4307_v2, %v1208_v4  ;;  %v3516_v7 = vpop.f32.mrb[14].mxu1  ;;  %v4312_v8 = vpop.f32.mrb[15].mxu0 }
 0x135   : > { %v1238_v9 = vmax.f32 %v4309_v5, %v3516_v7  ;;  %v4315_v10 = vpop.f32.mrb[15].mxu1 }
 0x136   : > { %v1236_v11 = vmax.f32 %v4312_v8, %v4315_v10 }
 0x139   : > { %v3521_v12 = vpop.f32.mrb[16].mxu0 }
 0x13a   : > { %v4319_v13 = vmax.f32 %v1225_v31, %v3521_v12  ;;  %v4321_v14 = vpop.f32.mrb[16].mxu1  ;;  %v1354_v15 = vpop.f32.mrb[17].mxu0 }
 0x13b   : > { %v4323_v16 = vmax.f32 %v1223_v34, %v1354_v15  ;;  %v4325_v17 = vpop.f32.mrb[17].mxu1  ;;  %v3522_v18 = vpop.f32.mrb[18].mxu0 }
 0x13c   : > { %v1613_v19 = vmax.f32 %v4319_v13, %v4321_v14  ;;  %v4329_v20 = vmax.f32 %v1226_v37, %v3522_v18  ;;  %v4331_v21 = vpop.f32.mrb[18].mxu1  ;;  %v1357_v22 = vpop.f32.mrb[19].mxu0 }
 0x13d   : > { %v1611_v23 = vmax.f32 %v4323_v16, %v4325_v17  ;;  %v4335_v24 = vmax.f32 %v1224_v39, %v1357_v22  ;;  %v4337_v25 = vpop.f32.mrb[19].mxu1 }
 0x13e   : > { %v1614_v26 = vmax.f32 %v4329_v20, %v4331_v21 }
 0x13f   : > { %v1612_v27 = vmax.f32 %v4335_v24, %v4337_v25 }
 0x141   : > { %v3525_v28 = vpop.f32.mrb[20].mxu0 }
 0x142   : > { %v4343_v29 = vmax.f32 %v1229_v43, %v3525_v28  ;;  %v4345_v30 = vpop.f32.mrb[20].mxu1  ;;  %v1370_v31 = vpop.f32.mrb[21].mxu0 }
 0x143   : > { %v4347_v32 = vmax.f32 %v1227_v46, %v1370_v31  ;;  %v4349_v33 = vpop.f32.mrb[21].mxu1  ;;  %v3526_v34 = vpop.f32.mrb[22].mxu0 }
 0x144   : > { %v1617_v35 = vmax.f32 %v4343_v29, %v4345_v30  ;;  %v4353_v36 = vmax.f32 %v1230_v49, %v3526_v34  ;;  %v4355_v37 = vpop.f32.mrb[22].mxu1  ;;  %v1373_v38 = vpop.f32.mrb[23].mxu0 }
 0x145   : > { %v1615_v39 = vmax.f32 %v4347_v32, %v4349_v33  ;;  %v4359_v40 = vmax.f32 %v1228_v51, %v1373_v38  ;;  %v4361_v41 = vpop.f32.mrb[23].mxu1 }
 0x146   : > { %v1618_v42 = vmax.f32 %v4353_v36, %v4355_v37 }
 0x147   : > { %v1616_v43 = vmax.f32 %v4359_v40, %v4361_v41 }
 0x149   : > { %v3529_v44 = vpop.f32.mrb[24].mxu0 }
 0x14a   : > { %v4367_v45 = vmax.f32 %v1233_v55, %v3529_v44  ;;  %v4369_v46 = vpop.f32.mrb[24].mxu1  ;;  %v1386_v47 = vpop.f32.mrb[25].mxu0 }
 0x14b   : > { %v4371_v48 = vmax.f32 %v1231_v58, %v1386_v47  ;;  %v4373_v49 = vpop.f32.mrb[25].mxu1  ;;  %v3530_v50 = vpop.f32.mrb[26].mxu0 }
 0x14c   : > { %v1621_v51 = vmax.f32 %v4367_v45, %v4369_v46  ;;  %v4377_v52 = vmax.f32 %v1234_v61, %v3530_v50  ;;  %v4379_v53 = vpop.f32.mrb[26].mxu1  ;;  %v1389_v54 = vpop.f32.mrb[27].mxu0 }
 0x14d   : > { %v1619_v55 = vmax.f32 %v4371_v48, %v4373_v49  ;;  %v4383_v56 = vmax.f32 %v1232_v63, %v1389_v54  ;;  %v4385_v57 = vpop.f32.mrb[27].mxu1 }
 0x14e   : > { %v1622_v58 = vmax.f32 %v4377_v52, %v4379_v53 }
 0x14f   : > { %v1620_v59 = vmax.f32 %v4383_v56, %v4385_v57 }
 0x151   : > { %v3533_v60 = vpop.f32.mrb[28].mxu0 }
 0x152   : > { %v4391_v62 = vmax.f32 %v1237_v3, %v3533_v60  ;;  %v4393_v61 = vpop.f32.mrb[28].mxu1  ;;  %v1402_v0 = vpop.f32.mrb[29].mxu0 }
 0x153   : > { %v4395_v1 = vmax.f32 %v1235_v6, %v1402_v0  ;;  %v4397_v2 = vpop.f32.mrb[29].mxu1  ;;  %v3534_v63 = vpop.f32.mrb[30].mxu0 }
 0x154   : > { %v1625_v4 = vmax.f32 %v4391_v62, %v4393_v61  ;;  %v4401_v5 = vmax.f32 %v1238_v9, %v3534_v63  ;;  %v4403_v7 = vpop.f32.mrb[30].mxu1  ;;  %v1405_v8 = vpop.f32.mrb[31].mxu0 }
 0x155   : > { %v1623_v3 = vmax.f32 %v4395_v1, %v4397_v2  ;;  %v4407_v10 = vmax.f32 %v1236_v11, %v1405_v8  ;;  %v4409_v12 = vpop.f32.mrb[31].mxu1 }
 0x156   : > { %v1626_v6 = vmax.f32 %v4401_v5, %v4403_v7 }
 0x157   : > { %v1624_v13 = vmax.f32 %v4407_v10, %v4409_v12 }
 0x159   : > { %v3557_v14 = vpop.f32.mrb[32].mxu0 }
 0x15a   : > { %v4415_v15 = vmax.f32 %v1613_v19, %v3557_v14  ;;  %v4417_v9 = vpop.f32.mrb[32].mxu1  ;;  %v1742_v16 = vpop.f32.mrb[33].mxu0 }
 0x15b   : > { %v4419_v17 = vmax.f32 %v1611_v23, %v1742_v16  ;;  %v4421_v18 = vpop.f32.mrb[33].mxu1  ;;  %v3558_v11 = vpop.f32.mrb[34].mxu0 }
 0x15c   : > { %v2001_v20 = vmax.f32 %v4415_v15, %v4417_v9  ;;  %v4425_v21 = vmax.f32 %v1614_v26, %v3558_v11  ;;  %v4427_v22 = vpop.f32.mrb[34].mxu1  ;;  %v1745_v24 = vpop.f32.mrb[35].mxu0 }
 0x15d   : > { %v1999_v19 = vmax.f32 %v4419_v17, %v4421_v18  ;;  %v4431_v25 = vmax.f32 %v1612_v27, %v1745_v24  ;;  %v4433_v28 = vpop.f32.mrb[35].mxu1 }
 0x15e   : > { %v2002_v23 = vmax.f32 %v4425_v21, %v4427_v22 }
 0x15f   : > { %v2000_v29 = vmax.f32 %v4431_v25, %v4433_v28 }
 0x161   : > { %v3561_v30 = vpop.f32.mrb[36].mxu0 }
 0x162   : > { %v4439_v31 = vmax.f32 %v1617_v35, %v3561_v30  ;;  %v4441_v26 = vpop.f32.mrb[36].mxu1  ;;  %v1758_v32 = vpop.f32.mrb[37].mxu0 }
 0x163   : > { %v4443_v33 = vmax.f32 %v1615_v39, %v1758_v32  ;;  %v4445_v34 = vpop.f32.mrb[37].mxu1  ;;  %v3562_v27 = vpop.f32.mrb[38].mxu0 }
 0x164   : > { %v2005_v36 = vmax.f32 %v4439_v31, %v4441_v26  ;;  %v4449_v37 = vmax.f32 %v1618_v42, %v3562_v27  ;;  %v4451_v38 = vpop.f32.mrb[38].mxu1  ;;  %v1761_v40 = vpop.f32.mrb[39].mxu0 }
 0x165   : > { %v2003_v35 = vmax.f32 %v4443_v33, %v4445_v34  ;;  %v4455_v41 = vmax.f32 %v1616_v43, %v1761_v40  ;;  %v4457_v44 = vpop.f32.mrb[39].mxu1 }
 0x166   : > { %v2006_v39 = vmax.f32 %v4449_v37, %v4451_v38 }
 0x167   : > { %v2004_v45 = vmax.f32 %v4455_v41, %v4457_v44 }
 0x169   : > { %v3565_v46 = vpop.f32.mrb[40].mxu0 }
 0x16a   : > { %v4463_v47 = vmax.f32 %v1621_v51, %v3565_v46  ;;  %v4465_v42 = vpop.f32.mrb[40].mxu1  ;;  %v1774_v48 = vpop.f32.mrb[41].mxu0 }
 0x16b   : > { %v4467_v49 = vmax.f32 %v1619_v55, %v1774_v48  ;;  %v4469_v50 = vpop.f32.mrb[41].mxu1  ;;  %v3566_v43 = vpop.f32.mrb[42].mxu0 }
 0x16c   : > { %v2009_v52 = vmax.f32 %v4463_v47, %v4465_v42  ;;  %v4473_v53 = vmax.f32 %v1622_v58, %v3566_v43  ;;  %v4475_v54 = vpop.f32.mrb[42].mxu1  ;;  %v1777_v56 = vpop.f32.mrb[43].mxu0 }
 0x16d   : > { %v2007_v51 = vmax.f32 %v4467_v49, %v4469_v50  ;;  %v4479_v57 = vmax.f32 %v1620_v59, %v1777_v56  ;;  %v4481_v60 = vpop.f32.mrb[43].mxu1 }
 0x16e   : > { %v2010_v55 = vmax.f32 %v4473_v53, %v4475_v54 }
 0x16f   : > { %v2008_v62 = vmax.f32 %v4479_v57, %v4481_v60 }
 0x171   : > { %v3569_v61 = vpop.f32.mrb[44].mxu0 }
 0x172   : > { %v4487_v0 = vmax.f32 %v1625_v4, %v3569_v61  ;;  %v4489_v58 = vpop.f32.mrb[44].mxu1  ;;  %v1790_v1 = vpop.f32.mrb[45].mxu0 }
 0x173   : > { %v4491_v2 = vmax.f32 %v1623_v3, %v1790_v1  ;;  %v4493_v63 = vpop.f32.mrb[45].mxu1  ;;  %v3570_v59 = vpop.f32.mrb[46].mxu0 }
 0x174   : > { %v2013_v5 = vmax.f32 %v4487_v0, %v4489_v58  ;;  %v4497_v7 = vmax.f32 %v1626_v6, %v3570_v59  ;;  %v4499_v8 = vpop.f32.mrb[46].mxu1  ;;  %v1793_v10 = vpop.f32.mrb[47].mxu0 }
 0x175   : > { %v2011_v4 = vmax.f32 %v4491_v2, %v4493_v63  ;;  %v4503_v12 = vmax.f32 %v1624_v13, %v1793_v10  ;;  %v4505_v14 = vpop.f32.mrb[47].mxu1 }
 0x176   : > { %v2014_v3 = vmax.f32 %v4497_v7, %v4499_v8 }
 0x177   : > { %v2012_v15 = vmax.f32 %v4503_v12, %v4505_v14 }
 0x179   : > { %v3593_v9 = vpop.f32.mrb[48].mxu0 }
 0x17a   : > { %v4511_v16 = vmax.f32 %v2001_v20, %v3593_v9  ;;  %v4513_v6 = vpop.f32.mrb[48].mxu1  ;;  %v2130_v17 = vpop.f32.mrb[49].mxu0 }
 0x17b   : > { %v4515_v18 = vmax.f32 %v1999_v19, %v2130_v17  ;;  %v4517_v11 = vpop.f32.mrb[49].mxu1  ;;  %v3594_v13 = vpop.f32.mrb[50].mxu0 }
 0x17c   : > { %v2389_v21 = vmax.f32 %v4511_v16, %v4513_v6  ;;  %v4521_v22 = vmax.f32 %v2002_v23, %v3594_v13  ;;  %v4523_v24 = vpop.f32.mrb[50].mxu1  ;;  %v2133_v25 = vpop.f32.mrb[51].mxu0 }
 0x17d   : > { %v2387_v20 = vmax.f32 %v4515_v18, %v4517_v11  ;;  %v4527_v28 = vmax.f32 %v2000_v29, %v2133_v25  ;;  %v4529_v30 = vpop.f32.mrb[51].mxu1  ;;  %v4610_v11 = vld [vmem:[%s4729_s4] ss:$0 sm:$0xff] }
 0x17e   : > { %v2390_v19 = vmax.f32 %v4521_v22, %v4523_v24 }
 0x17f   : > { %v2388_v31 = vmax.f32 %v4527_v28, %v4529_v30 }
 0x181   : > { %v3597_v26 = vpop.f32.mrb[52].mxu0 }
 0x182   : > { %v4535_v32 = vmax.f32 %v2005_v36, %v3597_v26  ;;  %v4537_v23 = vpop.f32.mrb[52].mxu1  ;;  %v2146_v33 = vpop.f32.mrb[53].mxu0 }
 0x183   : > { %v4539_v34 = vmax.f32 %v2003_v35, %v2146_v33  ;;  %v4541_v27 = vpop.f32.mrb[53].mxu1  ;;  %v3598_v29 = vpop.f32.mrb[54].mxu0 }
 0x184   : > { %v2393_v37 = vmax.f32 %v4535_v32, %v4537_v23  ;;  %v4545_v38 = vmax.f32 %v2006_v39, %v3598_v29  ;;  %v4547_v40 = vpop.f32.mrb[54].mxu1  ;;  %v2149_v41 = vpop.f32.mrb[55].mxu0 }
 0x185   : > { %v2391_v36 = vmax.f32 %v4539_v34, %v4541_v27  ;;  %v4551_v44 = vmax.f32 %v2004_v45, %v2149_v41  ;;  %v4553_v46 = vpop.f32.mrb[55].mxu1 }
 0x186   : > { %v2394_v35 = vmax.f32 %v4545_v38, %v4547_v40 }
 0x187   : > { %v2392_v47 = vmax.f32 %v4551_v44, %v4553_v46 }
 0x189   : > { %v3601_v42 = vpop.f32.mrb[56].mxu0 }
 0x18a   : > { %v4559_v48 = vmax.f32 %v2009_v52, %v3601_v42  ;;  %v4561_v39 = vpop.f32.mrb[56].mxu1  ;;  %v2162_v49 = vpop.f32.mrb[57].mxu0 }
 0x18b   : > { %v4563_v50 = vmax.f32 %v2007_v51, %v2162_v49  ;;  %v4565_v43 = vpop.f32.mrb[57].mxu1  ;;  %v3602_v45 = vpop.f32.mrb[58].mxu0 }
 0x18c   : > { %v2397_v53 = vmax.f32 %v4559_v48, %v4561_v39  ;;  %v4569_v54 = vmax.f32 %v2010_v55, %v3602_v45  ;;  %v4571_v56 = vpop.f32.mrb[58].mxu1  ;;  %v2165_v57 = vpop.f32.mrb[59].mxu0 }
 0x18d   : > { %v2395_v52 = vmax.f32 %v4563_v50, %v4565_v43  ;;  %v4575_v60 = vmax.f32 %v2008_v62, %v2165_v57  ;;  %v4577_v61 = vpop.f32.mrb[59].mxu1 }
 0x18e   : > { %v2398_v51 = vmax.f32 %v4569_v54, %v4571_v56 }
 0x18f   : > { %v2396_v0 = vmax.f32 %v4575_v60, %v4577_v61 }
 0x191   : > { %v3605_v58 = vpop.f32.mrb[60].mxu0 }
 0x192   : > { %v4583_v1 = vmax.f32 %v2013_v5, %v3605_v58  ;;  %v4585_v55 = vpop.f32.mrb[60].mxu1  ;;  %v2178_v2 = vpop.f32.mrb[61].mxu0 }
 0x193   : > { %v4587_v63 = vmax.f32 %v2011_v4, %v2178_v2  ;;  %v4589_v59 = vpop.f32.mrb[61].mxu1  ;;  %v3606_v62 = vpop.f32.mrb[62].mxu0 }
 0x194   : > { %v2401_v7 = vmax.f32 %v4583_v1, %v4585_v55  ;;  %v4593_v8 = vmax.f32 %v2014_v3, %v3606_v62  ;;  %v4595_v10 = vpop.f32.mrb[62].mxu1  ;;  %v2181_v12 = vpop.f32.mrb[63].mxu0 }
 0x195   : > { %v2399_v5 = vmax.f32 %v4587_v63, %v4589_v59  ;;  %v4599_v14 = vmax.f32 %v2012_v15, %v2181_v12  ;;  %v4601_v9 = vpop.f32.mrb[63].mxu1 }
 0x196   : > { %v2402_v4 = vmax.f32 %v4593_v8, %v4595_v10 }
 0x197   : > { %v2400_v16 = vmax.f32 %v4599_v14, %v4601_v9 }
 0x199   : > { %v3629_v6 = vpop.f32.mrb[64].mxu0 }
 0x19a   : > { %v2583_v17 = vmax.f32 %v2389_v21, %v3629_v6  ;;  %v3647_v3 = vpop.f32.mrb[64].mxu1  ;;  %v2518_v18 = vpop.f32.mrb[65].mxu0 }
 0x19b   : > { %v2581_v15 = vmax.f32 %v2387_v20, %v2518_v18  ;;  %v2715_v13 = vpop.f32.mrb[65].mxu1  ;;  %v3630_v22 = vpop.f32.mrb[66].mxu0 }
 0x19c   : > { %v2780_v24 = vadd.f32 %v3647_v3, %v2583_v17  ;;  %v2584_v25 = vmax.f32 %v2390_v19, %v3630_v22  ;;  %v3648_v28 = vpop.f32.mrb[66].mxu1  ;;  %v2521_v30 = vpop.f32.mrb[67].mxu0 }
 0x19d   : > { %v2778_v26 = vadd.f32 %v2715_v13, %v2581_v15  ;;  %v2582_v33 = vmax.f32 %v2388_v31, %v2521_v30  ;;  %v2718_v29 = vpop.f32.mrb[67].mxu1 }
 0x19e   : > { %v2803_v21 = vadd.f32 %v4610_v11, %v2780_v24  ;;  %v2781_v41 = vadd.f32 %v3648_v28, %v2584_v25 }
 0x19f   : > { %v2801_v42 = vadd.f32 %v4610_v11, %v2778_v26  ;;  %v2779_v49 = vadd.f32 %v2718_v29, %v2582_v33 }
 0x1a0   : > { %v2804_v45 = vadd.f32 %v4610_v11, %v2781_v41  ;;  %v2819_v58 = vmax.f32 %v2803_v21, 0.0 }
 0x1a1   : > { %v2802_v20 = vadd.f32 %v4610_v11, %v2779_v49  ;;  %v3633_v57 = vpop.f32.mrb[68].mxu0  ;;  %v2817_v12 = vmax.f32 %v2801_v42, 0.0 }
 0x1a2   : > { %v2820_v2 = vmax.f32 %v2804_v45, 0.0  ;;  %v2587_v19 = vmax.f32 %v2393_v37, %v3633_v57  ;;  %v3651_v31 = vpop.f32.mrb[68].mxu1  ;;  %v2534_v62 = vpop.f32.mrb[69].mxu0 }
 0x1a3   : > { %v2818_v6 = vmax.f32 %v2802_v20, 0.0  ;;  %v2585_v17 = vmax.f32 %v2391_v36, %v2534_v62  ;;  %v2731_v3 = vpop.f32.mrb[69].mxu1  ;;  %v3634_v18 = vpop.f32.mrb[70].mxu0 }
 0x1a4   : > { %v3352_v15 = vpack.c.bf16 %v2820_v2, %v2819_v58  ;;  %v2784_v13 = vadd.f32 %v3651_v31, %v2587_v19  ;;  %v2588_v22 = vmax.f32 %v2394_v35, %v3634_v18  ;;  %v3652_v24 = vpop.f32.mrb[70].mxu1  ;;  %v2537_v25 = vpop.f32.mrb[71].mxu0 }
 0x1a5   : > { %v3347_v32 = vpack.c.bf16 %v2818_v6, %v2817_v12  ;;  %v2782_v23 = vadd.f32 %v2731_v3, %v2585_v17  ;;  %v2586_v37 = vmax.f32 %v2392_v47, %v2537_v25  ;;  %v2734_v28 = vpop.f32.mrb[71].mxu1 }
 0x1a6   : > { %3384 = vst [vmem:[%s4629_s11 + $0x8] sm:$0xff] %v3352_v15   ;;  %v2807_v34 = vadd.f32 %v4610_v11, %v2784_v13  ;;  %v2785_v27 = vadd.f32 %v3652_v24, %v2588_v22 }
 0x1a7   : > { %3348 = vst [vmem:[%s4629_s11] sm:$0xff] %v3347_v32   ;;  %v2805_v38 = vadd.f32 %v4610_v11, %v2782_v23  ;;  %v2783_v40 = vadd.f32 %v2734_v28, %v2586_v37 }
 0x1a8   : > { %v2808_v36 = vadd.f32 %v4610_v11, %v2785_v27  ;;  %v2823_v44 = vmax.f32 %v2807_v34, 0.0 }
 0x1a9   : > { %v2806_v35 = vadd.f32 %v4610_v11, %v2783_v40  ;;  %v3637_v30 = vpop.f32.mrb[72].mxu0  ;;  %v2821_v29 = vmax.f32 %v2805_v38, 0.0 }
 0x1aa   : > { %v2824_v46 = vmax.f32 %v2808_v36, 0.0  ;;  %v2591_v47 = vmax.f32 %v2397_v53, %v3637_v30  ;;  %v3655_v26 = vpop.f32.mrb[72].mxu1  ;;  %v2550_v33 = vpop.f32.mrb[73].mxu0 }
 0x1ab   : > { %v2822_v21 = vmax.f32 %v2806_v35, 0.0  ;;  %v2589_v41 = vmax.f32 %v2395_v52, %v2550_v33  ;;  %v2747_v42 = vpop.f32.mrb[73].mxu1  ;;  %v3638_v49 = vpop.f32.mrb[74].mxu0 }
 0x1ac   : > { %v3362_v45 = vpack.c.bf16 %v2824_v46, %v2823_v44  ;;  %v2788_v20 = vadd.f32 %v3655_v26, %v2591_v47  ;;  %v2592_v57 = vmax.f32 %v2398_v51, %v3638_v49  ;;  %v3656_v48 = vpop.f32.mrb[74].mxu1  ;;  %v2553_v39 = vpop.f32.mrb[75].mxu0 }
 0x1ad   : > { %v3357_v53 = vpack.c.bf16 %v2822_v21, %v2821_v29  ;;  %v2786_v58 = vadd.f32 %v2747_v42, %v2589_v41  ;;  %v2590_v2 = vmax.f32 %v2396_v0, %v2553_v39  ;;  %v2750_v19 = vpop.f32.mrb[75].mxu1 }
 0x1ae   : > { %3386 = vst [vmem:[%s4629_s11 + $0x18] sm:$0xff] %v3362_v45   ;;  %v2811_v50 = vadd.f32 %v4610_v11, %v2788_v20  ;;  %v2789_v43 = vadd.f32 %v3656_v48, %v2592_v57 }
 0x1af   : > { %3385 = vst [vmem:[%s4629_s11 + $0x10] sm:$0xff] %v3357_v53   ;;  %v2809_v52 = vadd.f32 %v4610_v11, %v2786_v58  ;;  %v2787_v31 = vadd.f32 %v2750_v19, %v2590_v2 }
 0x1b0   : > { %v2812_v54 = vadd.f32 %v4610_v11, %v2789_v43  ;;  %v2827_v62 = vmax.f32 %v2811_v50, 0.0 }
 0x1b1   : > { %v2810_v56 = vadd.f32 %v4610_v11, %v2787_v31  ;;  %v3641_v51 = vpop.f32.mrb[76].mxu0  ;;  %v2825_v6 = vmax.f32 %v2809_v52, 0.0 }
 0x1b2   : > { %v2828_v12 = vmax.f32 %v2812_v54, 0.0  ;;  %v2595_v60 = vmax.f32 %v2401_v7, %v3641_v51  ;;  %v3659_v61 = vpop.f32.mrb[76].mxu1  ;;  %v2566_v0 = vpop.f32.mrb[77].mxu0 }
 0x1b3   : > { %v2826_v17 = vmax.f32 %v2810_v56, 0.0  ;;  %v2593_v3 = vmax.f32 %v2399_v5, %v2566_v0  ;;  %v2763_v18 = vpop.f32.mrb[77].mxu1  ;;  %v3642_v15 = vpop.f32.mrb[78].mxu0 }
 0x1b4   : > { %v3372_v13 = vpack.c.bf16 %v2828_v12, %v2827_v62  ;;  %v2792_v22 = vadd.f32 %v3659_v61, %v2595_v60  ;;  %v2596_v1 = vmax.f32 %v2402_v4, %v3642_v15  ;;  %v3660_v55 = vpop.f32.mrb[78].mxu1  ;;  %v2569_v7 = vpop.f32.mrb[79].mxu0 }
 0x1b5   : > { %v3367_v24 = vpack.c.bf16 %v2826_v17, %v2825_v6  ;;  %v2790_v25 = vadd.f32 %v2763_v18, %v2593_v3  ;;  %v2594_v63 = vmax.f32 %v2400_v16, %v2569_v7  ;;  %v2766_v59 = vpop.f32.mrb[79].mxu1 }
 0x1b6   : > { %3388 = vst [vmem:[%s4629_s11 + $0x28] sm:$0xff] %v3372_v13   ;;  %v2815_v5 = vadd.f32 %v4610_v11, %v2792_v22  ;;  %v2793_v32 = vadd.f32 %v3660_v55, %v2596_v1 }
 0x1b7   : > { %3387 = vst [vmem:[%s4629_s11 + $0x20] sm:$0xff] %v3367_v24   ;;  %v2813_v8 = vadd.f32 %v4610_v11, %v2790_v25  ;;  %v2791_v10 = vadd.f32 %v2766_v59, %v2594_v63 }
 0x1b8   : > { %v2816_v4 = vadd.f32 %v4610_v11, %v2793_v32  ;;  %v2831_v14 = vmax.f32 %v2815_v5, 0.0 }
 0x1b9   : > { %v2814_v23 = vadd.f32 %v4610_v11, %v2791_v10  ;;  %v2829_v16 = vmax.f32 %v2813_v8, 0.0 }
 0x1ba   : > { %v2832_v9 = vmax.f32 %v2816_v4, 0.0 }
 0x1bb   : > { %v2830_v37 = vmax.f32 %v2814_v23, 0.0 }
 0x1bc   : > { %v3382_v28 = vpack.c.bf16 %v2832_v9, %v2831_v14 }
 0x1bd   : > { %v3377_v34 = vpack.c.bf16 %v2830_v37, %v2829_v16 }
 0x1be   : > { %3390 = vst [vmem:[%s4629_s11 + $0x38] sm:$0xff] %v3382_v28  }
 0x1bf   : > { %3389 = vst [vmem:[%s4629_s11 + $0x30] sm:$0xff] %v3377_v34  }
 0x1c0   : > { %3807 = shalt.err (!%p3804_p7)
}
 0x1c1   : > { %s3808_s6 = scalar_lea.hbm %s4678_s17, 1024  ;;  %s3812_s9 = scalar_lea.hbm %s4730_s5, 4096 }
 0x1c2   : > { %p3809_p9 = scmp.ne.s32.totalorder %s4678_s17, %s3808_s6  ;;  %p3813_p12 = scmp.lt.u32.totalorder %s4678_s17, %s4730_s5 }
 0x1c3   : > { %p3814_p13 = scmp.lt.u32.totalorder %s3812_s9, %s3808_s6  ;;  %p3816_p1 = scmp.lt.u32.totalorder %s3808_s6, %s4678_s17 }
 0x1c4   : > { %p3810_p10 = pnand %p3809_p9, %p3930_p6 }
 0x1c5   : > { %p3815_p0 = por %p3814_p13, %p3813_p12 }
 0x1c6   : > { %p3811_p11 = pneg %p3810_p10 }
 0x1c7   : > { %p3817_p2 = por %p3816_p1, %p3815_p0 }
 0x1c9   : > { %p3818_p3 = pnand %p3817_p2, %p3811_p11 }
 0x1cb   : > { %3821 = shalt.err (!%p3818_p3)
}
 0x1cc   : > { %s3859_s12 = smov 64   ;;  %s3860_s15 = smov 4  }
 0x1cd   : > { %3673 = dma.vmem_to_hbm [thread:$0]  (%p3930_p6), %s4680_s13, 1024, %s4678_s17, %s2914_s22, %s3859_s12, %s3859_s12, %s3860_s15  }
 0x1ce PF: > { %p3679_p4 = scmp.ge.s32.totalorder %s3856_s21, 2  ;;  %s2942_s16 = sand.u32 1, %s3844_s18  }
 0x1cf   : > { %s2943_s23 = scalar_lea.sflag [#allocation4], %s2942_s16 }
 0x1d0   : > { %p3676_p5 = pnand %p3679_p4, %p3934_p8 }
 0x1d2   : > { %3839 = dma.done.wait (!%p3676_p5), %s2943_s23, 1024  }
 0x1d3   : > { %3841 = vsyncadd (!%p3676_p5), %s2943_s23, 4294966272  ;;  %p15_p7 = scmp.ge.s32.totalorder %s3916_s24, 6   ;;  %s4733_s18 = smov %s3848_s19 }
 0x1d4   : > { %s4734_s19 = smov %s3852_s20  ;;  %s4735_s20 = smov %s3928_s27 }
 0x1d5   : > { %s4736_s21 = smov %s3916_s24  ;;  %17 = sbr.rel (!%p15_p7) target bundleno = 3 (0x3), region = 132 }
 0x1dc   :  { %2948 = vsyncpa [#allocation4], 1 }
 0x1dd   :  { %2950 = vsyncpa [#allocation4 + $0x1], 1 }

</bundles_post_ra>
